<compile_context>
chip_gen: v7x
topology: tpu7x:2x2x1
jax: 0.10.0
libtpu: 0.0.40
codegen_flags: <defaults>
</compile_context>

<pallas_src>
import jax
import jax.numpy as jnp
from jax.experimental import pallas as pl
from jax.experimental.pallas import tpu as pltpu

STATE_DIM = 16
ACTION_DIM = 4
K = 5
H1 = 400
H2 = 300


def rpf_critic_kernel(c_ref, w1_ref, b1_ref, w2_ref, b2_ref, w3_ref, b3_ref,
                      out_ref):
    # c_ref : (1, B, D)        f32   (concat [x, a] for this ensemble member)
    # w1_ref: (1, D, 4*H1)     bf16  (layer-1 weights of the 4 MLPs, fused along N)
    # b1_ref: (1, 1, 4*H1)     f32
    # w2_ref: (1, 4, H1, H2)   bf16
    # b2_ref: (1, 4, H2)       f32
    # w3_ref: (1, 4, H2)       bf16  (single output column of l3/l6, stored as a row)
    # b3_ref: (1, 4, 1)        f32
    # out_ref:(1, B, 2)        f32   -> column 0 = q1, column 1 = q2
    # MLP order along the "4" axis: [model_head1, model_head2, prior_head1, prior_head2]
    c = c_ref[0].astype(jnp.bfloat16)                                   # (B, D)

    # Fused layer 1 for all 4 MLPs of this member: one lane-dense N=4*H1 MXU matmul.
    h1_all = jnp.dot(c, w1_ref[0], preferred_element_type=jnp.float32)  # (B, 4*H1)
    h1_all = jnp.maximum(h1_all + b1_ref[0, 0], 0.0)

    outs = []
    for j in range(4):  # static unroll over the 4 MLPs of this ensemble member
        h1_j = h1_all[:, j * H1:(j + 1) * H1].astype(jnp.bfloat16)      # (B, H1)
        h2_j = jnp.dot(h1_j, w2_ref[0, j],
                       preferred_element_type=jnp.float32)              # (B, H2)
        h2_j = jnp.maximum(h2_j + b2_ref[0, j], 0.0)
        # Layer 3 has a single output unit: VPU multiply + lane reduction
        # instead of an N=1 (1/128-lane) MXU matmul.
        w3_j = w3_ref[0, j].astype(jnp.float32)                         # (H2,)
        o_j = jnp.sum(h2_j * w3_j[None, :], axis=-1, keepdims=True)     # (B, 1)
        outs.append(o_j + b3_ref[0, j])

    # q1 = model.l3(...) + prior.l3(...).detach(); q2 = model.l6(...) + prior.l6(...).detach()
    q1 = outs[0] + outs[2]
    q2 = outs[1] + outs[3]
    out_ref[0] = jnp.concatenate([q1, q2], axis=-1)                     # single (B, 2) store


def _k_axis_semantics():
    """Use both TensorCores on v7x by sharding the K grid axis across cores."""
    kind = ""
    try:
        kind = jax.devices()[0].device_kind.lower()
    except Exception:
        pass
    if ("v7" in kind or "tpu7" in kind or "7x" in kind) and hasattr(pltpu, "CORE_PARALLEL"):
        return (pltpu.CORE_PARALLEL,)
    return ("parallel",)


def rpf_critic_forward(x, a, params):
    """params are in the packed kernel layout produced by pack_params()."""
    W1, B1, W2, B2, W3, B3 = params
    k = W1.shape[0]
    d = W1.shape[1]
    bsz = x.shape[0]

    if a.ndim == 3:
        # Per-member actions a[i] (the `len(a.shape) != 2` branch of the PyTorch module).
        xk = jnp.broadcast_to(x[None], (k, bsz, x.shape[1]))
        c = jnp.concatenate([xk, a], axis=-1).astype(jnp.float32)        # (K, B, D)
    else:
        c1 = jnp.concatenate([x, a], axis=-1).astype(jnp.float32)        # (B, D)
        c = jnp.broadcast_to(c1[None], (k, bsz, d))                      # (K, B, D)

    out = pl.pallas_call(
        rpf_critic_kernel,
        out_shape=jax.ShapeDtypeStruct((k, bsz, 2), jnp.float32),
        grid_spec=pltpu.PrefetchScalarGridSpec(
            num_scalar_prefetch=0,
            grid=(k,),
            in_specs=[
                pl.BlockSpec((1, bsz, d), lambda i: (i, 0, 0)),
                pl.BlockSpec((1, d, 4 * H1), lambda i: (i, 0, 0)),
                pl.BlockSpec((1, 1, 4 * H1), lambda i: (i, 0, 0)),
                pl.BlockSpec((1, 4, H1, H2), lambda i: (i, 0, 0, 0)),
                pl.BlockSpec((1, 4, H2), lambda i: (i, 0, 0)),
                pl.BlockSpec((1, 4, H2), lambda i: (i, 0, 0)),
                pl.BlockSpec((1, 4, 1), lambda i: (i, 0, 0)),
            ],
            out_specs=pl.BlockSpec((1, bsz, 2), lambda i: (i, 0, 0)),
        ),
        compiler_params=pltpu.CompilerParams(
            dimension_semantics=_k_axis_semantics()),
    )(c, W1, B1, W2, B2, W3, B3)

    q1 = out[:, :, 0:1]
    q2 = out[:, :, 1:2]
    return q1, q2


def init_params(key):
    # Deterministic synthetic init (not a checkpoint load). Raw, unfused layout:
    # nn.Linear sizes of Critic (D->400, 400->300, 300->1), pre-transposed to
    # (in, out), duplicated for the two heads and for {model, prior} -> axis of 4,
    # stacked over K ensemble members.
    d = STATE_DIM + ACTION_DIM
    ks = jax.random.split(key, 6)
    scale = 0.1
    W1 = scale * jax.random.normal(ks[0], (K, 4, d, H1), jnp.float32)
    B1 = scale * jax.random.normal(ks[1], (K, 4, H1), jnp.float32)
    W2 = scale * jax.random.normal(ks[2], (K, 4, H1, H2), jnp.float32)
    B2 = scale * jax.random.normal(ks[3], (K, 4, H2), jnp.float32)
    W3 = scale * jax.random.normal(ks[4], (K, 4, H2), jnp.float32)   # l3/l6 weight row
    B3 = scale * jax.random.normal(ks[5], (K, 4, 1), jnp.float32)
    return (W1, B1, W2, B2, W3, B3)


def pack_params(raw):
    """Pack raw params into the kernel layout:
       - layer-1 weights fused across the 4 MLPs into a lane-dense (K, D, 4*H1) matrix,
       - weights quantized to bf16 (kernel is HBM-bandwidth bound), biases kept f32."""
    W1, B1, W2, B2, W3, B3 = raw
    k, four, d, h1 = W1.shape
    W1f = jnp.transpose(W1, (0, 2, 1, 3)).reshape(k, d, four * h1).astype(jnp.bfloat16)
    B1f = B1.reshape(k, 1, four * h1)
    return (W1f, B1f, W2.astype(jnp.bfloat16), B2, W3.astype(jnp.bfloat16), B3)


def ref_forward(x, a, raw_params):
    # Pure-JAX reference of the same math (bf16 weights, f32 accumulation) for the
    # correctness check; mirrors the kernel's precision choices.
    W1, B1, W2, B2, W3, B3 = raw_params
    W1b = W1.astype(jnp.bfloat16)
    W2b = W2.astype(jnp.bfloat16)
    W3f = W3.astype(jnp.bfloat16).astype(jnp.float32)
    if a.ndim == 3:
        xk = jnp.broadcast_to(x[None], (a.shape[0],) + x.shape)
        c = jnp.concatenate([xk, a], axis=-1).astype(jnp.bfloat16)       # (K, B, D)
        h1 = jnp.einsum('kbd,kjdh->kjbh', c, W1b,
                        preferred_element_type=jnp.float32)
    else:
        c = jnp.concatenate([x, a], axis=-1).astype(jnp.bfloat16)        # (B, D)
        h1 = jnp.einsum('bd,kjdh->kjbh', c, W1b,
                        preferred_element_type=jnp.float32)
    h1 = jax.nn.relu(h1 + B1[:, :, None, :])
    h2 = jnp.einsum('kjbh,kjhm->kjbm', h1.astype(jnp.bfloat16), W2b,
                    preferred_element_type=jnp.float32)
    h2 = jax.nn.relu(h2 + B2[:, :, None, :])
    o = jnp.einsum('kjbm,kjm->kjb', h2, W3f)[..., None] + B3[:, :, None, :]
    return o[:, 0] + o[:, 2], o[:, 1] + o[:, 3]


if __name__ == "__main__":
    key = jax.random.PRNGKey(0)
    k_x, k_a, k_a3, k_p = jax.random.split(key, 4)
    B = 8
    x = jax.random.normal(k_x, (B, STATE_DIM), jnp.float32)
    a = jax.random.normal(k_a, (B, ACTION_DIM), jnp.float32)          # 2-D action branch
    a3 = jax.random.normal(k_a3, (K, B, ACTION_DIM), jnp.float32)     # per-member actions

    raw = init_params(k_p)
    params = pack_params(raw)

    # 2-D action branch (shared action).
    q1, q2 = rpf_critic_forward(x, a, params)
    q1 = jax.block_until_ready(q1)
    q2 = jax.block_until_ready(q2)
    r1, r2 = ref_forward(x, a, raw)
    assert q1.shape == (K, B, 1) and q2.shape == (K, B, 1)
    assert jnp.allclose(q1, r1, atol=1e-3, rtol=1e-3)
    assert jnp.allclose(q2, r2, atol=1e-3, rtol=1e-3)

    # 3-D action branch (a[i] per ensemble member).
    q1b, q2b = rpf_critic_forward(x, a3, params)
    q1b = jax.block_until_ready(q1b)
    q2b = jax.block_until_ready(q2b)
    r1b, r2b = ref_forward(x, a3, raw)
    assert q1b.shape == (K, B, 1) and q2b.shape == (K, B, 1)
    assert jnp.allclose(q1b, r1b, atol=1e-3, rtol=1e-3)
    assert jnp.allclose(q2b, r2b, atol=1e-3, rtol=1e-3)

    print("KERNEL_OK")
</pallas_src>

<mosaic_0001>
module attributes {stable_mosaic.version = 11 : i64} {
  func.func @rpf_critic_kernel(%arg0: i32, %arg1: memref<1x8x20xf32, #tpu.memory_space<vmem>>, %arg2: memref<1x20x1600xbf16, #tpu.memory_space<vmem>>, %arg3: memref<1x1x1600xf32, #tpu.memory_space<vmem>>, %arg4: memref<1x4x400x300xbf16, #tpu.memory_space<vmem>>, %arg5: memref<1x4x300xf32, #tpu.memory_space<vmem>>, %arg6: memref<1x4x300xbf16, #tpu.memory_space<vmem>>, %arg7: memref<1x4x1xf32, #tpu.memory_space<vmem>>, %arg8: memref<1x8x2xf32, #tpu.memory_space<vmem>>) attributes {dimension_semantics = [#tpu.dimension_semantics<parallel>], iteration_bounds = array<i64: 5>, scalar_prefetch = 0 : i64, scratch_operands = 0 : i64, tpu.core_type = #tpu.core_type<tc>, window_params = [{transform_indices = @transform_0, window_bounds = array<i64: 1, 8, 20>}, {transform_indices = @transform_1, window_bounds = array<i64: 1, 20, 1600>}, {transform_indices = @transform_2, window_bounds = array<i64: 1, 1, 1600>}, {transform_indices = @transform_3, window_bounds = array<i64: 1, 4, 400, 300>}, {transform_indices = @transform_4, window_bounds = array<i64: 1, 4, 300>}, {transform_indices = @transform_5, window_bounds = array<i64: 1, 4, 300>}, {transform_indices = @transform_6, window_bounds = array<i64: 1, 4, 1>}, {transform_indices = @transform_7, window_bounds = array<i64: 1, 8, 2>}]} {
    %c0 = arith.constant 0 : index
    %c0_0 = arith.constant 0 : index
    %c0_1 = arith.constant 0 : index
    %0 = vector.load %arg1[%c0, %c0_0, %c0_1] : memref<1x8x20xf32, #tpu.memory_space<vmem>>, vector<1x8x20xf32>
    %1 = vector.shape_cast %0 : vector<1x8x20xf32> to vector<8x20xf32>
    %2 = arith.truncf %1 : vector<8x20xf32> to vector<8x20xbf16>
    %c0_2 = arith.constant 0 : index
    %c0_3 = arith.constant 0 : index
    %c0_4 = arith.constant 0 : index
    %3 = vector.load %arg2[%c0_2, %c0_3, %c0_4] : memref<1x20x1600xbf16, #tpu.memory_space<vmem>>, vector<1x20x1600xbf16>
    %4 = vector.shape_cast %3 : vector<1x20x1600xbf16> to vector<20x1600xbf16>
    %cst = arith.constant dense<0.000000e+00> : vector<8x1600xf32>
    %5 = tpu.matmul %2, %4, %cst {dimension_numbers = #tpu.dot_dimension_numbers<[1], [0], [0], [1], [0, 0, 1, 1], [], []>} : vector<8x20xbf16>, vector<20x1600xbf16>, vector<8x1600xf32> -> vector<8x1600xf32>
    %c0_5 = arith.constant 0 : index
    %c0_6 = arith.constant 0 : index
    %c0_7 = arith.constant 0 : index
    %6 = vector.load %arg3[%c0_5, %c0_6, %c0_7] : memref<1x1x1600xf32, #tpu.memory_space<vmem>>, vector<1x1x1600xf32>
    %7 = vector.shape_cast %6 : vector<1x1x1600xf32> to vector<1600xf32>
    %8 = vector.shape_cast %7 : vector<1600xf32> to vector<1x1600xf32>
    %9 = vector.broadcast %8 : vector<1x1600xf32> to vector<8x1600xf32>
    %10 = arith.addf %5, %9 : vector<8x1600xf32>
    %cst_8 = arith.constant 0.000000e+00 : f32
    %11 = vector.broadcast %cst_8 : f32 to vector<8x1600xf32>
    %12 = arith.maximumf %10, %11 : vector<8x1600xf32>
    %13 = vector.extract_strided_slice %12 {offsets = [0, 0], sizes = [8, 400], strides = [1, 1]} : vector<8x1600xf32> to vector<8x400xf32>
    %14 = arith.truncf %13 : vector<8x400xf32> to vector<8x400xbf16>
    %c0_9 = arith.constant 0 : index
    %c0_10 = arith.constant 0 : index
    %c0_11 = arith.constant 0 : index
    %c0_12 = arith.constant 0 : index
    %15 = vector.load %arg4[%c0_9, %c0_10, %c0_11, %c0_12] : memref<1x4x400x300xbf16, #tpu.memory_space<vmem>>, vector<1x1x400x300xbf16>
    %16 = vector.shape_cast %15 : vector<1x1x400x300xbf16> to vector<400x300xbf16>
    %cst_13 = arith.constant dense<0.000000e+00> : vector<8x300xf32>
    %17 = tpu.matmul %14, %16, %cst_13 {dimension_numbers = #tpu.dot_dimension_numbers<[1], [0], [0], [1], [0, 0, 1, 1], [], []>} : vector<8x400xbf16>, vector<400x300xbf16>, vector<8x300xf32> -> vector<8x300xf32>
    %c0_14 = arith.constant 0 : index
    %c0_15 = arith.constant 0 : index
    %c0_16 = arith.constant 0 : index
    %18 = vector.load %arg5[%c0_14, %c0_15, %c0_16] : memref<1x4x300xf32, #tpu.memory_space<vmem>>, vector<1x1x300xf32>
    %19 = vector.shape_cast %18 : vector<1x1x300xf32> to vector<300xf32>
    %20 = vector.shape_cast %19 : vector<300xf32> to vector<1x300xf32>
    %21 = vector.broadcast %20 : vector<1x300xf32> to vector<8x300xf32>
    %22 = arith.addf %17, %21 : vector<8x300xf32>
    %cst_17 = arith.constant 0.000000e+00 : f32
    %23 = vector.broadcast %cst_17 : f32 to vector<8x300xf32>
    %24 = arith.maximumf %22, %23 : vector<8x300xf32>
    %c0_18 = arith.constant 0 : index
    %c0_19 = arith.constant 0 : index
    %c0_20 = arith.constant 0 : index
    %25 = vector.load %arg6[%c0_18, %c0_19, %c0_20] : memref<1x4x300xbf16, #tpu.memory_space<vmem>>, vector<1x1x300xbf16>
    %26 = vector.shape_cast %25 : vector<1x1x300xbf16> to vector<300xbf16>
    %27 = arith.extf %26 : vector<300xbf16> to vector<300xf32>
    %28 = vector.shape_cast %27 : vector<300xf32> to vector<1x300xf32>
    %29 = vector.broadcast %28 : vector<1x300xf32> to vector<8x300xf32>
    %30 = arith.mulf %24, %29 : vector<8x300xf32>
    %cst_21 = arith.constant dense<0.000000e+00> : vector<8xf32>
    %31 = vector.multi_reduction <add>, %30, %cst_21 [1] : vector<8x300xf32> to vector<8xf32>
    %32 = vector.shape_cast %31 : vector<8xf32> to vector<8x1xf32>
    %c0_22 = arith.constant 0 : index
    %c0_23 = arith.constant 0 : index
    %c0_24 = arith.constant 0 : index
    %33 = vector.load %arg7[%c0_22, %c0_23, %c0_24] : memref<1x4x1xf32, #tpu.memory_space<vmem>>, vector<1x1x1xf32>
    %34 = vector.shape_cast %33 : vector<1x1x1xf32> to vector<1xf32>
    %35 = vector.shape_cast %34 : vector<1xf32> to vector<1x1xf32>
    %36 = vector.broadcast %35 : vector<1x1xf32> to vector<8x1xf32>
    %37 = arith.addf %32, %36 : vector<8x1xf32>
    %38 = vector.extract_strided_slice %12 {offsets = [0, 400], sizes = [8, 400], strides = [1, 1]} : vector<8x1600xf32> to vector<8x400xf32>
    %39 = arith.truncf %38 : vector<8x400xf32> to vector<8x400xbf16>
    %c0_25 = arith.constant 0 : index
    %c1 = arith.constant 1 : index
    %c0_26 = arith.constant 0 : index
    %c0_27 = arith.constant 0 : index
    %40 = vector.load %arg4[%c0_25, %c1, %c0_26, %c0_27] : memref<1x4x400x300xbf16, #tpu.memory_space<vmem>>, vector<1x1x400x300xbf16>
    %41 = vector.shape_cast %40 : vector<1x1x400x300xbf16> to vector<400x300xbf16>
    %cst_28 = arith.constant dense<0.000000e+00> : vector<8x300xf32>
    %42 = tpu.matmul %39, %41, %cst_28 {dimension_numbers = #tpu.dot_dimension_numbers<[1], [0], [0], [1], [0, 0, 1, 1], [], []>} : vector<8x400xbf16>, vector<400x300xbf16>, vector<8x300xf32> -> vector<8x300xf32>
    %c0_29 = arith.constant 0 : index
    %c1_30 = arith.constant 1 : index
    %c0_31 = arith.constant 0 : index
    %43 = vector.load %arg5[%c0_29, %c1_30, %c0_31] : memref<1x4x300xf32, #tpu.memory_space<vmem>>, vector<1x1x300xf32>
    %44 = vector.shape_cast %43 : vector<1x1x300xf32> to vector<300xf32>
    %45 = vector.shape_cast %44 : vector<300xf32> to vector<1x300xf32>
    %46 = vector.broadcast %45 : vector<1x300xf32> to vector<8x300xf32>
    %47 = arith.addf %42, %46 : vector<8x300xf32>
    %cst_32 = arith.constant 0.000000e+00 : f32
    %48 = vector.broadcast %cst_32 : f32 to vector<8x300xf32>
    %49 = arith.maximumf %47, %48 : vector<8x300xf32>
    %c0_33 = arith.constant 0 : index
    %c1_34 = arith.constant 1 : index
    %c0_35 = arith.constant 0 : index
    %50 = vector.load %arg6[%c0_33, %c1_34, %c0_35] : memref<1x4x300xbf16, #tpu.memory_space<vmem>>, vector<1x1x300xbf16>
    %51 = vector.shape_cast %50 : vector<1x1x300xbf16> to vector<300xbf16>
    %52 = arith.extf %51 : vector<300xbf16> to vector<300xf32>
    %53 = vector.shape_cast %52 : vector<300xf32> to vector<1x300xf32>
    %54 = vector.broadcast %53 : vector<1x300xf32> to vector<8x300xf32>
    %55 = arith.mulf %49, %54 : vector<8x300xf32>
    %cst_36 = arith.constant dense<0.000000e+00> : vector<8xf32>
    %56 = vector.multi_reduction <add>, %55, %cst_36 [1] : vector<8x300xf32> to vector<8xf32>
    %57 = vector.shape_cast %56 : vector<8xf32> to vector<8x1xf32>
    %c0_37 = arith.constant 0 : index
    %c1_38 = arith.constant 1 : index
    %c0_39 = arith.constant 0 : index
    %58 = vector.load %arg7[%c0_37, %c1_38, %c0_39] : memref<1x4x1xf32, #tpu.memory_space<vmem>>, vector<1x1x1xf32>
    %59 = vector.shape_cast %58 : vector<1x1x1xf32> to vector<1xf32>
    %60 = vector.shape_cast %59 : vector<1xf32> to vector<1x1xf32>
    %61 = vector.broadcast %60 : vector<1x1xf32> to vector<8x1xf32>
    %62 = arith.addf %57, %61 : vector<8x1xf32>
    %63 = vector.extract_strided_slice %12 {offsets = [0, 800], sizes = [8, 400], strides = [1, 1]} : vector<8x1600xf32> to vector<8x400xf32>
    %64 = arith.truncf %63 : vector<8x400xf32> to vector<8x400xbf16>
    %c0_40 = arith.constant 0 : index
    %c2 = arith.constant 2 : index
    %c0_41 = arith.constant 0 : index
    %c0_42 = arith.constant 0 : index
    %65 = vector.load %arg4[%c0_40, %c2, %c0_41, %c0_42] : memref<1x4x400x300xbf16, #tpu.memory_space<vmem>>, vector<1x1x400x300xbf16>
    %66 = vector.shape_cast %65 : vector<1x1x400x300xbf16> to vector<400x300xbf16>
    %cst_43 = arith.constant dense<0.000000e+00> : vector<8x300xf32>
    %67 = tpu.matmul %64, %66, %cst_43 {dimension_numbers = #tpu.dot_dimension_numbers<[1], [0], [0], [1], [0, 0, 1, 1], [], []>} : vector<8x400xbf16>, vector<400x300xbf16>, vector<8x300xf32> -> vector<8x300xf32>
    %c0_44 = arith.constant 0 : index
    %c2_45 = arith.constant 2 : index
    %c0_46 = arith.constant 0 : index
    %68 = vector.load %arg5[%c0_44, %c2_45, %c0_46] : memref<1x4x300xf32, #tpu.memory_space<vmem>>, vector<1x1x300xf32>
    %69 = vector.shape_cast %68 : vector<1x1x300xf32> to vector<300xf32>
    %70 = vector.shape_cast %69 : vector<300xf32> to vector<1x300xf32>
    %71 = vector.broadcast %70 : vector<1x300xf32> to vector<8x300xf32>
    %72 = arith.addf %67, %71 : vector<8x300xf32>
    %cst_47 = arith.constant 0.000000e+00 : f32
    %73 = vector.broadcast %cst_47 : f32 to vector<8x300xf32>
    %74 = arith.maximumf %72, %73 : vector<8x300xf32>
    %c0_48 = arith.constant 0 : index
    %c2_49 = arith.constant 2 : index
    %c0_50 = arith.constant 0 : index
    %75 = vector.load %arg6[%c0_48, %c2_49, %c0_50] : memref<1x4x300xbf16, #tpu.memory_space<vmem>>, vector<1x1x300xbf16>
    %76 = vector.shape_cast %75 : vector<1x1x300xbf16> to vector<300xbf16>
    %77 = arith.extf %76 : vector<300xbf16> to vector<300xf32>
    %78 = vector.shape_cast %77 : vector<300xf32> to vector<1x300xf32>
    %79 = vector.broadcast %78 : vector<1x300xf32> to vector<8x300xf32>
    %80 = arith.mulf %74, %79 : vector<8x300xf32>
    %cst_51 = arith.constant dense<0.000000e+00> : vector<8xf32>
    %81 = vector.multi_reduction <add>, %80, %cst_51 [1] : vector<8x300xf32> to vector<8xf32>
    %82 = vector.shape_cast %81 : vector<8xf32> to vector<8x1xf32>
    %c0_52 = arith.constant 0 : index
    %c2_53 = arith.constant 2 : index
    %c0_54 = arith.constant 0 : index
    %83 = vector.load %arg7[%c0_52, %c2_53, %c0_54] : memref<1x4x1xf32, #tpu.memory_space<vmem>>, vector<1x1x1xf32>
    %84 = vector.shape_cast %83 : vector<1x1x1xf32> to vector<1xf32>
    %85 = vector.shape_cast %84 : vector<1xf32> to vector<1x1xf32>
    %86 = vector.broadcast %85 : vector<1x1xf32> to vector<8x1xf32>
    %87 = arith.addf %82, %86 : vector<8x1xf32>
    %88 = vector.extract_strided_slice %12 {offsets = [0, 1200], sizes = [8, 400], strides = [1, 1]} : vector<8x1600xf32> to vector<8x400xf32>
    %89 = arith.truncf %88 : vector<8x400xf32> to vector<8x400xbf16>
    %c0_55 = arith.constant 0 : index
    %c3 = arith.constant 3 : index
    %c0_56 = arith.constant 0 : index
    %c0_57 = arith.constant 0 : index
    %90 = vector.load %arg4[%c0_55, %c3, %c0_56, %c0_57] : memref<1x4x400x300xbf16, #tpu.memory_space<vmem>>, vector<1x1x400x300xbf16>
    %91 = vector.shape_cast %90 : vector<1x1x400x300xbf16> to vector<400x300xbf16>
    %cst_58 = arith.constant dense<0.000000e+00> : vector<8x300xf32>
    %92 = tpu.matmul %89, %91, %cst_58 {dimension_numbers = #tpu.dot_dimension_numbers<[1], [0], [0], [1], [0, 0, 1, 1], [], []>} : vector<8x400xbf16>, vector<400x300xbf16>, vector<8x300xf32> -> vector<8x300xf32>
    %c0_59 = arith.constant 0 : index
    %c3_60 = arith.constant 3 : index
    %c0_61 = arith.constant 0 : index
    %93 = vector.load %arg5[%c0_59, %c3_60, %c0_61] : memref<1x4x300xf32, #tpu.memory_space<vmem>>, vector<1x1x300xf32>
    %94 = vector.shape_cast %93 : vector<1x1x300xf32> to vector<300xf32>
    %95 = vector.shape_cast %94 : vector<300xf32> to vector<1x300xf32>
    %96 = vector.broadcast %95 : vector<1x300xf32> to vector<8x300xf32>
    %97 = arith.addf %92, %96 : vector<8x300xf32>
    %cst_62 = arith.constant 0.000000e+00 : f32
    %98 = vector.broadcast %cst_62 : f32 to vector<8x300xf32>
    %99 = arith.maximumf %97, %98 : vector<8x300xf32>
    %c0_63 = arith.constant 0 : index
    %c3_64 = arith.constant 3 : index
    %c0_65 = arith.constant 0 : index
    %100 = vector.load %arg6[%c0_63, %c3_64, %c0_65] : memref<1x4x300xbf16, #tpu.memory_space<vmem>>, vector<1x1x300xbf16>
    %101 = vector.shape_cast %100 : vector<1x1x300xbf16> to vector<300xbf16>
    %102 = arith.extf %101 : vector<300xbf16> to vector<300xf32>
    %103 = vector.shape_cast %102 : vector<300xf32> to vector<1x300xf32>
    %104 = vector.broadcast %103 : vector<1x300xf32> to vector<8x300xf32>
    %105 = arith.mulf %99, %104 : vector<8x300xf32>
    %cst_66 = arith.constant dense<0.000000e+00> : vector<8xf32>
    %106 = vector.multi_reduction <add>, %105, %cst_66 [1] : vector<8x300xf32> to vector<8xf32>
    %107 = vector.shape_cast %106 : vector<8xf32> to vector<8x1xf32>
    %c0_67 = arith.constant 0 : index
    %c3_68 = arith.constant 3 : index
    %c0_69 = arith.constant 0 : index
    %108 = vector.load %arg7[%c0_67, %c3_68, %c0_69] : memref<1x4x1xf32, #tpu.memory_space<vmem>>, vector<1x1x1xf32>
    %109 = vector.shape_cast %108 : vector<1x1x1xf32> to vector<1xf32>
    %110 = vector.shape_cast %109 : vector<1xf32> to vector<1x1xf32>
    %111 = vector.broadcast %110 : vector<1x1xf32> to vector<8x1xf32>
    %112 = arith.addf %107, %111 : vector<8x1xf32>
    %113 = arith.addf %37, %87 : vector<8x1xf32>
    %114 = arith.addf %62, %112 : vector<8x1xf32>
    %115 = tpu.concatenate %113, %114 in 1 : vector<8x1xf32>, vector<8x1xf32> -> vector<8x2xf32>
    %c0_70 = arith.constant 0 : index
    %c0_71 = arith.constant 0 : index
    %c0_72 = arith.constant 0 : index
    %116 = vector.load %arg8[%c0_70, %c0_71, %c0_72] : memref<1x8x2xf32, #tpu.memory_space<vmem>>, vector<1x8x2xf32>
    %117 = vector.shape_cast %116 : vector<1x8x2xf32> to vector<8x2xf32>
    %118 = vector.shape_cast %115 : vector<8x2xf32> to vector<1x8x2xf32>
    tpu.vector_store %arg8[%c0_70, %c0_71, %c0_72], %118 {strides = array<i32>} : memref<1x8x2xf32, #tpu.memory_space<vmem>>, vector<1x8x2xf32>,
    return
  }
  func.func @transform_0(%arg0: i32) -> (i32, i32, i32) {
    %c0_i32 = arith.constant 0 : i32
    %c0_i32_0 = arith.constant 0 : i32
    %c0_i32_1 = arith.constant 0 : i32
    return %arg0, %c0_i32, %c0_i32_0 : i32, i32, i32
  }
  func.func @transform_1(%arg0: i32) -> (i32, i32, i32) {
    %c0_i32 = arith.constant 0 : i32
    %c0_i32_0 = arith.constant 0 : i32
    %c0_i32_1 = arith.constant 0 : i32
    return %arg0, %c0_i32, %c0_i32_0 : i32, i32, i32
  }
  func.func @transform_2(%arg0: i32) -> (i32, i32, i32) {
    %c0_i32 = arith.constant 0 : i32
    %c0_i32_0 = arith.constant 0 : i32
    %c0_i32_1 = arith.constant 0 : i32
    return %arg0, %c0_i32, %c0_i32_0 : i32, i32, i32
  }
  func.func @transform_3(%arg0: i32) -> (i32, i32, i32, i32) {
    %c0_i32 = arith.constant 0 : i32
    %c0_i32_0 = arith.constant 0 : i32
    %c0_i32_1 = arith.constant 0 : i32
    %c0_i32_2 = arith.constant 0 : i32
    return %arg0, %c0_i32, %c0_i32_0, %c0_i32_1 : i32, i32, i32, i32
  }
  func.func @transform_4(%arg0: i32) -> (i32, i32, i32) {
    %c0_i32 = arith.constant 0 : i32
    %c0_i32_0 = arith.constant 0 : i32
    %c0_i32_1 = arith.constant 0 : i32
    return %arg0, %c0_i32, %c0_i32_0 : i32, i32, i32
  }
  func.func @transform_5(%arg0: i32) -> (i32, i32, i32) {
    %c0_i32 = arith.constant 0 : i32
    %c0_i32_0 = arith.constant 0 : i32
    %c0_i32_1 = arith.constant 0 : i32
    return %arg0, %c0_i32, %c0_i32_0 : i32, i32, i32
  }
  func.func @transform_6(%arg0: i32) -> (i32, i32, i32) {
    %c0_i32 = arith.constant 0 : i32
    %c0_i32_0 = arith.constant 0 : i32
    %c0_i32_1 = arith.constant 0 : i32
    return %arg0, %c0_i32, %c0_i32_0 : i32, i32, i32
  }
  func.func @transform_7(%arg0: i32) -> (i32, i32, i32) {
    %c0_i32 = arith.constant 0 : i32
    %c0_i32_0 = arith.constant 0 : i32
    %c0_i32_1 = arith.constant 0 : i32
    return %arg0, %c0_i32, %c0_i32_0 : i32, i32, i32
  }
}

</mosaic_0001>

<bundles_post_ra>
// kernel: tpu_custom_call.1
= control target key start
LH: loop header
LB: loop body
LE: loop exit
PB: predicated region body
PF: predicated region fallthrough
CT: control target
= control target key end

     0   :  { %s6694_s0 = inlined_call_operand.hbm [shape: f32[5,8,20], index: 0, kind: input, shape index: {}]   ;;  %s6695_s1 = inlined_call_operand.hbm [shape: bf16[5,20,1600], index: 1, kind: input, shape index: {}]   ;;  %s6696_s2 = inlined_call_operand.hbm [shape: f32[5,1,1600], index: 2, kind: input, shape index: {}]   ;;  %s6697_s3 = inlined_call_operand.hbm [shape: bf16[5,4,400,300], index: 3, kind: input, shape index: {}]   ;;  %s6698_s4 = inlined_call_operand.hbm [shape: f32[5,4,300], index: 4, kind: input, shape index: {}]   ;;  %s6699_s5 = inlined_call_operand.hbm [shape: bf16[5,4,300], index: 5, kind: input, shape index: {}]   ;;  %s6700_s6 = inlined_call_operand.vmem [shape: f32[5,4,1], index: 6, kind: input, shape index: {}]   ;;  %s6701_s7 = inlined_call_operand.vmem [shape: f32[5,8,2], index: 7, kind: output, shape index: {}]  }
   0x1   :  { %6707 = sst [smem:[#allocation18_spill]] %s6694_s0 }
   0x2   :  { %6708 = sst [smem:[#allocation19_spill]] %s6695_s1 }
   0x3   :  { %6709 = sst [smem:[#allocation20_spill]] %s6697_s3 }
   0x4   :  { %12 = vsyncpa [#allocation3], 0 }
   0x5   :  { %14 = vsyncpa [#allocation3 + $0x1], 0 }
   0x6   :  { %15 = vsyncpa [#allocation5], 0 }
   0x7   :  { %17 = vsyncpa [#allocation5 + $0x1], 0 }
   0x8   :  { %18 = vsyncpa [#allocation8], 0 }
   0x9   :  { %20 = vsyncpa [#allocation8 + $0x1], 0 }
   0xa   :  { %21 = vsyncpa [#allocation11], 0 }
   0xb   :  { %23 = vsyncpa [#allocation11 + $0x1], 0  ;;  %s5820_s24 = smov 0   ;;  %s5822_s25 = smov 0  }
   0xc   :  { %s5824_s26 = smov 0   ;;  %s5826_s27 = smov 0  }
   0xd LB: > { %6710 = sst [smem:[#allocation16_spill]] %s5757_s26  ;;  %s5839_s28 = sadd.s32 4294967295, %s5761_s27   ;;  %s5761_s27 = sphi %s5826_s27, %s6729_s27   ;;  %s5757_s26 = sphi %s5824_s26, %s6726_s26   ;;  %s5753_s25 = sphi %s5822_s25, %s6728_s25   ;;  %s5749_s24 = sphi %s5820_s24, %s6727_s24  }
   0xe   : > { %s5842_s29 = sadd.s32 1, %s5761_s27   ;;  %s36_s8 = sadd.s32 1, %s5757_s26 }
   0xf   : > { %s33_s30 = ssub.s32 %s5761_s27, %s5842_s29  ;;  %p43_p1 = scmp.ne.s32.totalorder %s5757_s26, %s5753_s25 }
  0x10   : > { %p34_p0 = scmp.eq.s32.totalorder %s33_s30, 0  ;;  %p44_p2 = scmp.eq.s32.totalorder %s5761_s27, 0 }
  0x11   : > { %p49_p3 = scmp.ne.s32.totalorder %s5753_s25, %s5749_s24  ;;  %p50_p5 = scmp.eq.s32.totalorder %s5839_s28, 0 }
  0x12   : > { %s5852_s9 = scalar_select %p34_p0, %s5757_s26, %s36_s8  }
  0x13   : > { %p45_p4 = por %p44_p2, %p43_p1  ;;  %p5059_p6 = scmp.lt.s32.totalorder %s5761_s27, 5 }
  0x14   : > { %6711 = sst [smem:[#allocation17_spill]] %s5852_s9  ;;  %p5856_p7 = por %p50_p5, %p49_p3 }
  0x15   : > { %s5861_s11 = sand.u32 1, %s5757_s26   ;;  %p5863_p8 = pnand %p5059_p6, %p45_p4 }
  0x16   : > { %s6712_s10 = scalar_select %p5856_p7, 1, 0 }
  0x17   : > { %s6713_s12 = scalar_select %p5863_p8, 1, 0 }
  0x18   : > { %s6703_s13 = sand.u32 1, %s5761_s27   ;;  %s5013_s14 = smul.u32 156, %s5861_s11 }
  0x19   : > { %s5014_s15 = smul.u32 2496, %s5761_s27  ;;  %s6714_s1 = sld [smem:[#allocation19_spill]] }
  0x1a   : > { %s277_s19 = scalar_lea.vmem [#allocation4], %s5013_s14  ;;  %s5879_s21 = scalar_lea.sflag [#allocation5], %s6703_s13 }
  0x1b   : > { %s284_s20 = sshll.u32 %s277_s19, 4  ;;  %p5885_p10 = pneg %p5863_p8  ;;  %s5875_s20 = int_to_ptr.vmem [resolvable:$true] %s284_s20 }
  0x1f   : > { %s5873_s18 = scalar_lea.hbm %s6714_s1, %s5014_s15  ;;  %s5540_s8 = scalar_lea.hbm %s6714_s1, 12480 }
  0x20   : > { %s5535_s22 = scalar_lea.hbm %s5873_s18, 2496  ;;  %p5541_p13 = scmp.lt.u32.totalorder %s5873_s18, %s6714_s1 }
  0x21   : > { %p5536_p9 = scmp.ne.s32.totalorder %s5873_s18, %s5535_s22  ;;  %p5542_p0 = scmp.lt.u32.totalorder %s5540_s8, %s5535_s22 }
  0x22   : > { %p5544_p2 = scmp.lt.u32.totalorder %s5535_s22, %s5873_s18 }
  0x23   : > { %p5538_p11 = pnand %p5885_p10, %p5536_p9  ;;  %p5543_p1 = por %p5542_p0, %p5541_p13 }
  0x25   : > { %p5539_p12 = pneg %p5538_p11  ;;  %p5545_p3 = por %p5544_p2, %p5543_p1 }
  0x27   : > { %p5546_p4 = pnand %p5545_p3, %p5539_p12 }
  0x29   : > { %5549 = shalt.err (!%p5546_p4)
}
  0x2a   : > { %s5550_s16 = scalar_lea.vmem %s5875_s20, 2496  ;;  %s5763_s17 = smov [#allocation4]  }
  0x2b   : > { %p5551_p5 = scmp.ne.s32.totalorder %s5875_s20, %s5550_s16  ;;  %s5555_s19 = sshll.u32 %s5763_s17, 4  ;;  %s5556_s19 = int_to_ptr.vmem [resolvable:$false] %s5555_s19 }
  0x2c   : > { %s5557_s24 = scalar_lea.vmem %s5556_s19, 4992  ;;  %p5558_p11 = scmp.lt.s32.totalorder %s5875_s20, %s5556_s19 }
  0x2d   : > { %p5553_p6 = pnand %p5551_p5, %p5885_p10  ;;  %p5559_p7 = scmp.lt.s32.totalorder %s5557_s24, %s5550_s16 }
  0x2f   : > { %p5554_p9 = pneg %p5553_p6  ;;  %p5560_p13 = por %p5559_p7, %p5558_p11 }
  0x31   : > { %p5561_p0 = pnand %p5560_p13, %p5554_p9 }
  0x33   : > { %5564 = shalt.err (!%p5561_p0)
}
  0x34   : > { %s5764_s22 = smov 832   ;;  %s5765_s30 = smov 52  }
  0x35   : > { %5046 = dma.hbm_to_vmem [thread:$0]  (!%p5863_p8), %s5873_s18, 2496, %s5875_s20, %s5879_s21, %s5764_s22, %s5764_s22, %s5765_s30  }
  0x36   : > { %p4230_p12 = scmp.ge.s32.totalorder %s5761_s27, 1  ;;  %p377_p1 = scmp.lt.s32.totalorder %s5761_s27, 6 }
  0x37   : > { %s5017_s8 = smul.u32 2400, %s5861_s11  ;;  %s6717_s3 = sld [smem:[#allocation20_spill]] }
  0x38   : > { %p5912_p7 = pnand %p4230_p12, %p377_p1  ;;  %s5018_s15 = smul.u32 38400, %s5761_s27 }
  0x39   : > { %s317_s24 = scalar_lea.vmem [#allocation7], %s5017_s8  ;;  %s6718_s18 = sand.u32 1, %s5761_s27  }
  0x3a   : > { %s6716_s14 = scalar_select %p5912_p7, 1, 0 }
  0x3b   : > { %s324_s13 = sshll.u32 %s317_s24, 4  ;;  %s5926_s20 = scalar_lea.sflag [#allocation8], %s6718_s18  ;;  %s5922_s13 = int_to_ptr.vmem [resolvable:$true] %s324_s13 }
  0x3d   : > { %s5920_s19 = scalar_lea.hbm %s6717_s3, %s5018_s15  ;;  %s5570_s15 = scalar_lea.hbm %s6717_s3, 192000 }
  0x3e   : > { %s5565_s22 = scalar_lea.hbm %s5920_s19, 38400  ;;  %p5571_p5 = scmp.lt.u32.totalorder %s5920_s19, %s6717_s3 }
  0x3f   : > { %p5566_p2 = scmp.ne.s32.totalorder %s5920_s19, %s5565_s22  ;;  %p5572_p6 = scmp.lt.u32.totalorder %s5570_s15, %s5565_s22 }
  0x40   : > { %p5574_p11 = scmp.lt.u32.totalorder %s5565_s22, %s5920_s19 }
  0x41   : > { %p5568_p3 = pnand %p5566_p2, %p5885_p10  ;;  %p5573_p9 = por %p5572_p6, %p5571_p5 }
  0x43   : > { %p5569_p4 = pneg %p5568_p3  ;;  %p5575_p13 = por %p5574_p11, %p5573_p9 }
  0x45   : > { %p5576_p0 = pnand %p5575_p13, %p5569_p4 }
  0x47   : > { %5579 = shalt.err (!%p5576_p0)
}
  0x48   : > { %s5580_s8 = scalar_lea.vmem %s5922_s13, 38400  ;;  %s5766_s24 = smov [#allocation7]  }
  0x49   : > { %p5581_p12 = scmp.ne.s32.totalorder %s5922_s13, %s5580_s8  ;;  %s5585_s18 = sshll.u32 %s5766_s24, 4  ;;  %s5586_s18 = int_to_ptr.vmem [resolvable:$false] %s5585_s18 }
  0x4a   : > { %s5587_s1 = scalar_lea.vmem %s5586_s18, 76800  ;;  %p5588_p3 = scmp.lt.s32.totalorder %s5922_s13, %s5586_s18 }
  0x4b   : > { %p5583_p1 = pnand %p5581_p12, %p5885_p10  ;;  %p5589_p7 = scmp.lt.s32.totalorder %s5587_s1, %s5580_s8 }
  0x4d   : > { %p5584_p2 = pneg %p5583_p1  ;;  %p5590_p5 = por %p5589_p7, %p5588_p3 }
  0x4f   : > { %p5591_p6 = pnand %p5590_p5, %p5584_p2 }
  0x51   : > { %5594 = shalt.err (!%p5591_p6)
}
  0x52   : > { %s5767_s22 = smov 192   ;;  %s5768_s30 = smov 12  }
  0x53   : > { %5052 = dma.hbm_to_vmem [thread:$0]  (!%p5863_p8), %s5920_s19, 38400, %s5922_s13, %s5926_s20, %s5767_s22, %s5767_s22, %s5768_s30  }
  0x54   : > { %s4223_s16 = sshll.u32 %s5861_s11, 3  ;;  %s4224_s15 = sshll.u32 %s5761_s27, 7 }
  0x55   : > { %s6719_s0 = sld [smem:[#allocation18_spill]]  ;;  %s259_s18 = scalar_lea.vmem [#allocation2], %s4223_s16 }
  0x56   : > { %s266_s1 = sshll.u32 %s259_s18, 4  ;;  %s5015_s3 = smul.u32 13, %s5861_s11  ;;  %s5957_s1 = int_to_ptr.vmem [resolvable:$true] %s266_s1 }
  0x57   : > { %s256_s9 = scalar_lea.sflag [#allocation3], %s5861_s11 }
  0x5b   : > { %s5955_s24 = scalar_lea.hbm %s6719_s0, %s4224_s15  ;;  %s5600_s22 = scalar_lea.hbm %s6719_s0, 640 }
  0x5c   : > { %s5595_s26 = scalar_lea.hbm %s5955_s24, 128  ;;  %p5601_p11 = scmp.lt.u32.totalorder %s5955_s24, %s6719_s0 }
  0x5d   : > { %p5596_p7 = scmp.ne.s32.totalorder %s5955_s24, %s5595_s26  ;;  %p5602_p13 = scmp.lt.u32.totalorder %s5600_s22, %s5595_s26 }
  0x5e   : > { %p5604_p12 = scmp.lt.u32.totalorder %s5595_s26, %s5955_s24 }
  0x5f   : > { %p5598_p4 = pnand %p5596_p7, %p5885_p10  ;;  %p5603_p0 = por %p5602_p13, %p5601_p11 }
  0x61   : > { %p5599_p9 = pneg %p5598_p4  ;;  %p5605_p1 = por %p5604_p12, %p5603_p0 }
  0x63   : > { %p5606_p2 = pnand %p5605_p1, %p5599_p9 }
  0x65   : > { %5609 = shalt.err (!%p5606_p2)
}
  0x66   : > { %s5610_s16 = scalar_lea.vmem %s5957_s1, 128  ;;  %s5769_s17 = smov [#allocation2]  }
  0x67   : > { %p5611_p3 = scmp.ne.s32.totalorder %s5957_s1, %s5610_s16  ;;  %s5615_s8 = sshll.u32 %s5769_s17, 4  ;;  %s5616_s8 = int_to_ptr.vmem [resolvable:$false] %s5615_s8 }
  0x68   : > { %s5617_s18 = scalar_lea.vmem %s5616_s8, 256  ;;  %p5618_p7 = scmp.lt.s32.totalorder %s5957_s1, %s5616_s8 }
  0x69   : > { %p5613_p5 = pnand %p5611_p3, %p5885_p10  ;;  %p5619_p4 = scmp.lt.s32.totalorder %s5617_s18, %s5610_s16 }
  0x6b   : > { %p5614_p6 = pneg %p5613_p5  ;;  %p5620_p11 = por %p5619_p4, %p5618_p7 }
  0x6d   : > { %p5621_p13 = pnand %p5620_p11, %p5614_p6 }
  0x6f   : > { %5624 = shalt.err (!%p5621_p13)
}
  0x70   : > { %5043 = dma.hbm_to_vmem [thread:$0]  (!%p5863_p8), %s5955_s24, 128, %s5957_s1, %s256_s9  }
  0x71   : > { %s5016_s26 = smul.u32 208, %s5761_s27  ;;  %s298_s13 = scalar_lea.vmem [#allocation6], %s5015_s3 }
  0x72   : > { %s306_s19 = sshll.u32 %s298_s13, 4  ;;  %s5019_s22 = smul.u32 12, %s5861_s11  ;;  %s307_s19 = int_to_ptr.vmem [resolvable:$true] %s306_s19 }
  0x73   : > { %s304_s16 = scalar_lea.hbm %s6696_s2, %s5016_s26  ;;  %s5630_s0 = scalar_lea.hbm %s6696_s2, 1040 }
  0x74   : > { %s5625_s17 = scalar_lea.hbm %s304_s16, 208  ;;  %p5631_p1 = scmp.lt.u32.totalorder %s304_s16, %s6696_s2 }
  0x75   : > { %p5626_p9 = scmp.ne.s32.totalorder %s304_s16, %s5625_s17  ;;  %p5632_p2 = scmp.lt.u32.totalorder %s5630_s0, %s5625_s17 }
  0x76   : > { %p5634_p5 = scmp.lt.u32.totalorder %s5625_s17, %s304_s16 }
  0x77   : > { %p5628_p0 = pnand %p5626_p9, %p5885_p10  ;;  %p5633_p3 = por %p5632_p2, %p5631_p1 }
  0x79   : > { %p5629_p12 = pneg %p5628_p0  ;;  %p5635_p6 = por %p5634_p5, %p5633_p3 }
  0x7b   : > { %p5636_p7 = pnand %p5635_p6, %p5629_p12 }
  0x7d   : > { %5639 = shalt.err (!%p5636_p7)
}
  0x7e   : > { %s5640_s3 = scalar_lea.vmem %s307_s19, 208  ;;  %s5770_s1 = smov [#allocation6]  }
  0x7f   : > { %p5641_p4 = scmp.ne.s32.totalorder %s307_s19, %s5640_s3  ;;  %s5645_s26 = sshll.u32 %s5770_s1, 4  ;;  %s5646_s26 = int_to_ptr.vmem [resolvable:$false] %s5645_s26 }
  0x80   : > { %s5647_s13 = scalar_lea.vmem %s5646_s26, 416  ;;  %p5648_p9 = scmp.lt.s32.totalorder %s307_s19, %s5646_s26 }
  0x81   : > { %p5643_p11 = pnand %p5641_p4, %p5885_p10  ;;  %p5649_p0 = scmp.lt.s32.totalorder %s5647_s13, %s5640_s3 }
  0x83   : > { %p5644_p13 = pneg %p5643_p11  ;;  %p5650_p8 = por %p5649_p0, %p5648_p9 }
  0x85   : > { %p5651_p1 = pnand %p5650_p8, %p5644_p13 }
  0x87   : > { %5654 = shalt.err (!%p5651_p1)
}
  0x88   : > { %p6720_p2 = scmp.ne.s32.totalorder %s6713_s12, 0  ;;  %s5020_s0 = smul.u32 192, %s5761_s27 }
  0x89   : > { %s338_s30 = scalar_lea.vmem [#allocation9], %s5019_s22  ;;  %s5660_s1 = scalar_lea.hbm %s6698_s4, 960 }
  0x8a   : > { %5049 = dma.hbm_to_vmem [thread:$0]  (!%p6720_p2), %s304_s16, 208, %s307_s19, %s5879_s21  }
  0x8b   : > { %s346_s15 = sshll.u32 %s338_s30, 4  ;;  %s344_s18 = scalar_lea.hbm %s6698_s4, %s5020_s0  ;;  %s347_s15 = int_to_ptr.vmem [resolvable:$true] %s346_s15 }
  0x8c   : > { %s5655_s9 = scalar_lea.hbm %s344_s18, 192  ;;  %p5661_p5 = scmp.lt.u32.totalorder %s344_s18, %s6698_s4 }
  0x8d   : > { %p5656_p12 = scmp.ne.s32.totalorder %s344_s18, %s5655_s9  ;;  %p5662_p6 = scmp.lt.u32.totalorder %s5660_s1, %s5655_s9 }
  0x8e   : > { %p5664_p4 = scmp.lt.u32.totalorder %s5655_s9, %s344_s18 }
  0x8f   : > { %p5658_p8 = pnand %p5656_p12, %p5885_p10  ;;  %p5663_p7 = por %p5662_p6, %p5661_p5 }
  0x91   : > { %p5659_p3 = pneg %p5658_p8  ;;  %p5665_p11 = por %p5664_p4, %p5663_p7 }
  0x93   : > { %p5666_p13 = pnand %p5665_p11, %p5659_p3 }
  0x95   : > { %5669 = shalt.err (!%p5666_p13)
}
  0x96   : > { %s5670_s19 = scalar_lea.vmem %s347_s15, 192  ;;  %s5771_s22 = smov [#allocation9]  }
  0x97   : > { %p5671_p9 = scmp.ne.s32.totalorder %s347_s15, %s5670_s19  ;;  %s5675_s16 = sshll.u32 %s5771_s22, 4  ;;  %s5676_s16 = int_to_ptr.vmem [resolvable:$false] %s5675_s16 }
  0x98   : > { %s5677_s13 = scalar_lea.vmem %s5676_s16, 384  ;;  %p5678_p12 = scmp.lt.s32.totalorder %s347_s15, %s5676_s16 }
  0x99   : > { %p5673_p0 = pnand %p5671_p9, %p5885_p10  ;;  %p5679_p8 = scmp.lt.s32.totalorder %s5677_s13, %s5670_s19 }
  0x9b   : > { %p5674_p1 = pneg %p5673_p0  ;;  %p5680_p2 = por %p5679_p8, %p5678_p12 }
  0x9d   : > { %p5681_p5 = pnand %p5680_p2, %p5674_p1 }
  0x9f   : > { %5684 = shalt.err (!%p5681_p5)
}
  0xa0   : > { %p6721_p6 = scmp.ne.s32.totalorder %s6713_s12, 0  ;;  %s5021_s0 = smul.u32 6, %s5861_s11 }
  0xa1   : > { %s5022_s30 = smul.u32 96, %s5761_s27  ;;  %s354_s1 = scalar_lea.sflag [#allocation11], %s5861_s11 }
  0xa2   : > { %5055 = dma.hbm_to_vmem [thread:$0]  (!%p6721_p6), %s344_s18, 192, %s347_s15, %s5926_s20  }
  0xa3   : > { %s6026_s9 = scalar_lea.hbm %s6699_s5, %s5022_s30  ;;  %s357_s24 = scalar_lea.vmem [#allocation10], %s5021_s0 }
  0xa4   : > { %s365_s3 = sshll.u32 %s357_s24, 4  ;;  %s5685_s26 = scalar_lea.hbm %s6026_s9, 96  ;;  %s366_s3 = int_to_ptr.vmem [resolvable:$true] %s365_s3 }
  0xa5   : > { %p5686_p2 = scmp.ne.s32.totalorder %s6026_s9, %s5685_s26  ;;  %s5690_s15 = scalar_lea.hbm %s6699_s5, 480 }
  0xa6   : > { %p5691_p4 = scmp.lt.u32.totalorder %s6026_s9, %s6699_s5  ;;  %p5692_p11 = scmp.lt.u32.totalorder %s5690_s15, %s5685_s26 }
  0xa7   : > { %p5688_p3 = pnand %p5686_p2, %p5885_p10  ;;  %p5694_p9 = scmp.lt.u32.totalorder %s5685_s26, %s6026_s9 }
  0xa8   : > { %p5693_p13 = por %p5692_p11, %p5691_p4 }
  0xa9   : > { %p5689_p7 = pneg %p5688_p3 }
  0xaa   : > { %p5695_p0 = por %p5694_p9, %p5693_p13 }
  0xac   : > { %p5696_p1 = pnand %p5695_p0, %p5689_p7 }
  0xae   : > { %5699 = shalt.err (!%p5696_p1)
}
  0xaf   : > { %s5700_s11 = scalar_lea.vmem %s366_s3, 96  ;;  %s5772_s19 = smov [#allocation10]  }
  0xb0   : > { %p5701_p12 = scmp.ne.s32.totalorder %s366_s3, %s5700_s11  ;;  %s5705_s22 = sshll.u32 %s5772_s19, 4  ;;  %s5706_s22 = int_to_ptr.vmem [resolvable:$false] %s5705_s22 }
  0xb1   : > { %s5707_s16 = scalar_lea.vmem %s5706_s22, 192  ;;  %p5708_p2 = scmp.lt.s32.totalorder %s366_s3, %s5706_s22 }
  0xb2   : > { %p5703_p8 = pnand %p5701_p12, %p5885_p10  ;;  %p5709_p3 = scmp.lt.s32.totalorder %s5707_s16, %s5700_s11 }
  0xb4   : > { %p5704_p5 = pneg %p5703_p8  ;;  %p5710_p6 = por %p5709_p3, %p5708_p2 }
  0xb6   : > { %p5711_p4 = pnand %p5710_p6, %p5704_p5 }
  0xb8   : > { %5714 = shalt.err (!%p5711_p4)
}
  0xb9   : > { %p6722_p11 = scmp.ne.s32.totalorder %s6713_s12, 0  ;;  %p6723_p7 = scmp.ne.s32.totalorder %s6716_s14, 0 }
  0xba   : > { %s383_s23 = sand.u32 (!%p6723_p7), 1, %s5753_s25   ;;  %p6724_p10 = scmp.ne.s32.totalorder (!%p6723_p7), %s6712_s10, 0 }
  0xbb   : > { %5058 = dma.hbm_to_vmem [thread:$0]  (!%p6722_p11), %s6026_s9, 96, %s366_s3, %s354_s1  }
  0xbc   : > { %381 = sbr.rel (%p6723_p7) target bundleno = 1258 (0x4ea), region = 48  ;;  %s4231_s13 = sshll.u32 (!%p6723_p7), %s383_s23, 3 }
  0xbd   : > { %s384_s0 = scalar_lea.sflag (!%p6723_p7), [#allocation3], %s383_s23  ;;  %s6049_s30 = scalar_lea.vmem (!%p6723_p7), [#allocation2], %s4231_s13 }
  0xc3   : > { %5732 = dma.done.wait (%p6724_p10), %s384_s0, 128  }
  0xc4   : > { %5734 = vsyncadd (%p6724_p10), %s384_s0, 4294967168  ;;  %s392_s12 = sand.u32 1, %s5839_s28   ;;  %s5023_s17 = smul.u32 156, %s383_s23 }
  0xc5   : > { %s393_s8 = scalar_lea.sflag [#allocation5], %s392_s12 }
  0xc6   : > { %s6056_s9 = scalar_lea.vmem [#allocation4], %s5023_s17 }
  0xc7   : > { %5736 = dma.done.wait (%p6724_p10), %s393_s8, 2704  }
  0xc8   : > { %5738 = vsyncadd (%p6724_p10), %s393_s8, 4294964592  ;;  %s5024_s14 = smul.u32 13, %s383_s23  ;;  %s411_s1 = scalar_lea.sflag [#allocation8], %s392_s12 }
  0xc9   : > { %s5025_s24 = smul.u32 2400, %s383_s23 }
  0xca   : > { %s6062_s3 = scalar_lea.vmem [#allocation6], %s5024_s14 }
  0xcb   : > { %s6064_s26 = scalar_lea.vmem [#allocation7], %s5025_s24 }
  0xcc   : > { %5740 = dma.done.wait (%p6724_p10), %s411_s1, 38592  }
  0xcd   : > { %5742 = vsyncadd (%p6724_p10), %s411_s1, 4294928704  ;;  %s5026_s20 = smul.u32 12, %s383_s23  ;;  %s429_s18 = scalar_lea.sflag [#allocation11], %s383_s23 }
  0xce   : > { %s5027_s27 = smul.u32 6, %s383_s23 }
  0xcf   : > { %s6070_s15 = scalar_lea.vmem [#allocation9], %s5026_s20 }
  0xd0   : > { %s6072_s21 = scalar_lea.vmem [#allocation10], %s5027_s27 }
  0xd1   : > { %5744 = dma.done.wait (%p6724_p10), %s429_s18, 96  }
  0xd2   : > { %5746 = vsyncadd (%p6724_p10), %s429_s18, 4294967200  ;;  %v5773_v0 = vmov 0   ;;  %v5103_v1 = vld [vmem:[%s6056_s9 + $0x4] ss:$52 sps:$4 sm:$0xff]   ;;  %v5105_v2 = vld [vmem:[%s6056_s9] ss:$52 sps:$4 sm:$0xff]  }
  0xd3   : > { %767 = vmatprep.mubr.bf16.mxu0 %v5773_v0  ;;  %808 = vmatprep.mubr.bf16.mxu1 %v5773_v0  ;;  %v516_v3 = vld [vmem:[%s6056_s9 + $0x68] sm:$0x33]  ;;  %vm695_vm0 = vcmask 1041408   ;;  %v500_v8 = vld [vmem:[%s6049_s30] sm:$0xff]  ;;  %vm691_vm1 = vcmask 162816   ;;  %v5774_v42 = vmov 0.0  }
  0xd4   : > { %735 = vmatprep.subr.bf16.mxu0 %v5103_v1  ;;  %v4248_v4 = vcombine.high %v516_v3, %v516_v3  ;;  %v5107_v5 = vld [vmem:[%s6056_s9 + $0xc] ss:$52 sps:$4 sm:$0xff]   ;;  %v4247_v6 = vcombine.low %v516_v3, %v516_v3  ;;  %v5110_v7 = vld [vmem:[%s6056_s9 + $0x8] ss:$52 sps:$4 sm:$0xff]   ;;  %v517_v9 = vld [vmem:[%s6056_s9 + $0x70] sm:$0x33]  ;;  %v6091_v15 = vpack.c.bf16 %v500_v8, %v500_v8 }
  0xd5   : > { %736 = vmatpush1.bf16.msra.mxu0 %v5105_v2  ;;  %776 = vmatprep.subr.bf16.mxu1 %v5107_v5  ;;  %v4250_v11 = vcombine.high %v517_v9, %v517_v9  ;;  %v5114_v12 = vld [vmem:[%s6056_s9 + $0x14] ss:$52 sps:$4 sm:$0xff]   ;;  %v4249_v13 = vcombine.low %v517_v9, %v517_v9  ;;  %v518_v14 = vld [vmem:[%s6056_s9 + $0x78] sm:$0x33]  ;;  %v5112_v18 = vld [vmem:[%s6056_s9 + $0x10] ss:$52 sps:$4 sm:$0xff]  }
  0xd6   : > { %4260 = vmatprep.subr.msk.bf16.mxu0 %vm695_vm0, %v4248_v4  ;;  %v697_v10 = vsel %vm695_vm0, %v4247_v6, 0  ;;  %777 = vmatpush1.bf16.msra.mxu1 %v5110_v7  ;;  %v5119_v17 = vld [vmem:[%s6056_s9 + $0x1c] ss:$52 sps:$4 sm:$0xff]   ;;  %v519_v19 = vld [vmem:[%s6056_s9 + $0x80] sm:$0x33]  ;;  %v4252_v20 = vcombine.high %v518_v14, %v518_v14  ;;  %v4251_v21 = vcombine.low %v518_v14, %v518_v14  ;;  %vm5775_vm2 = vmmov 0  }
  0xd7   : > { %4262 = vmatprep.subr.msk.bf16.mxu1 %vm695_vm0, %v4250_v11  ;;  %v703_v16 = vsel %vm695_vm0, %v4249_v13, 0  ;;  %v5117_v22 = vld [vmem:[%s6056_s9 + $0x18] ss:$52 sps:$4 sm:$0xff]   ;;  %v4254_v23 = vcombine.high %v519_v19, %v519_v19  ;;  %v4253_v24 = vcombine.low %v519_v19, %v519_v19  ;;  %v5123_v30 = vld [vmem:[%s6056_s9 + $0x20] ss:$52 sps:$4 sm:$0xff]   ;;  %vm1555_vm3 = vcmask 130048  }
  0xd8   : > { %v709_v25 = vsel %vm695_vm0, %v4251_v21, 0  ;;  %v5125_v26 = vld [vmem:[%s6056_s9 + $0x24] ss:$52 sps:$4 sm:$0xff]   ;;  %v520_v27 = vld [vmem:[%s6056_s9 + $0x88] sm:$0x33]  ;;  %s5776_s10 = smov 112  }
  0xd9   : > { %738 = vmatpush1.bf16.msra.mxu0 %v697_v10  ;;  %v715_v28 = vsel %vm695_vm0, %v4253_v24, 0  ;;  %v5130_v29 = vld [vmem:[%s6056_s9 + $0x2c] ss:$52 sps:$4 sm:$0xff]   ;;  %v521_v31 = vld [vmem:[%s6056_s9 + $0x90] sm:$0x33]  ;;  %v4256_v32 = vcombine.high %v520_v27, %v520_v27  ;;  %v4255_v33 = vcombine.low %v520_v27, %v520_v27  ;;  %s5777_s11 = smov 96  }
  0xda   : > { %817 = vmatprep.subr.bf16.mxu0 %v5114_v12  ;;  %779 = vmatpush1.bf16.msra.mxu1 %v703_v16  ;;  %v5128_v34 = vld [vmem:[%s6056_s9 + $0x28] ss:$52 sps:$4 sm:$0xff]   ;;  %v4258_v35 = vcombine.high %v521_v31, %v521_v31  ;;  %v4257_v36 = vcombine.low %v521_v31, %v521_v31  ;;  %v5145_v40 = vld [vmem:[%s6056_s9 + $0x30] ss:$52 sps:$4 sm:$0xff]   ;;  %s5778_s19 = smov 80   ;;  %vm1905_vm4 = vcmask 916480  }
  0xdb   : > { %858 = vmatprep.subr.bf16.mxu1 %v5119_v17  ;;  %v721_v37 = vsel %vm695_vm0, %v4255_v33, 0  ;;  %v5135_v39 = vld [vmem:[%s6064_s26 + $0x4] ss:$12 sps:$4 sm:$0xff]   ;;  %v5133_v43 = vld [vmem:[%s6064_s26] ss:$12 sps:$4 sm:$0xff]   ;;  %vm2654_vm5 = vcmask 785408  }
  0xdc   : > { %4261 = vmatmul.mubr.msk.bf16.vlgmr.msra.gmra.mrb[0].mxu0 %vm691_vm1, %v6091_v15  ;;  %v727_v38 = vsel %vm695_vm0, %v4257_v36, 0  ;;  %v5149_v41 = vld [vmem:[%s6056_s9 + $0x98] ss:$0 sps:$4 sm:$0x33]   ;;  %v5138_v44 = vld [vmem:[%s6064_s26 + $0x1c] ss:$12 sps:$4 sm:$0xff]  }
  0xdd   : > { %818 = vmatpush1.bf16.msra.mxu0 %v5112_v18  ;;  %849 = vmatprep.mubr.bf16.mxu0 %v5773_v0  ;;  %v733_v45 = vsel %vm695_vm0, %v5149_v41, 0  ;;  %v5162_v46 = vld [vmem:[%s6064_s26 + $0xc8] ss:$12 sps:$4 sm:$0xff]   ;;  %v5136_v47 = vld [vmem:[%s6064_s26 + $0x18] ss:$12 sps:$4 sm:$0xff]   ;;  %vm3408_vm6 = vcmask 654336  }
  0xde   : > { %4263 = vmatmul.mubr.msk.bf16.vlgmr.msra.gmra.mrb[0].mxu1 %vm691_vm1, %v6091_v15  ;;  %4264 = vmatprep.subr.msk.bf16.mxu0 %vm695_vm0, %v4252_v20  ;;  %v5141_v48 = vld [vmem:[%s6064_s26 + $0x34] ss:$12 sps:$4 sm:$0xff]   ;;  %v5139_v51 = vld [vmem:[%s6064_s26 + $0x30] ss:$12 sps:$4 sm:$0xff]   ;;  %v5144_v52 = vld [vmem:[%s6064_s26 + $0x4c] ss:$12 sps:$4 sm:$0xff]  }
  0xdf   : > { %859 = vmatpush1.bf16.msra.mxu1 %v5117_v22  ;;  %890 = vmatprep.mubr.bf16.mxu1 %v5773_v0  ;;  %v5163_v49 = vld [vmem:[%s6064_s26 + $0x8] ss:$12 sps:$4 sm:$0xff]   ;;  %v5167_v50 = vld [vmem:[%s6064_s26 + $0xe0] ss:$12 sps:$4 sm:$0xff]   ;;  %v5172_v54 = vld [vmem:[%s6064_s26 + $0xf8] ss:$12 sps:$4 sm:$0xff]  }
  0xe0   : > { %4266 = vmatprep.subr.msk.bf16.mxu1 %vm695_vm0, %v4254_v23  ;;  %v5168_v53 = vld [vmem:[%s6064_s26 + $0x20] ss:$12 sps:$4 sm:$0xff]   ;;  %v5142_v55 = vld [vmem:[%s6064_s26 + $0x48] ss:$12 sps:$4 sm:$0xff]   ;;  %v5148_v56 = vld [vmem:[%s6064_s26 + $0x64] ss:$12 sps:$4 sm:$0xff]  }
  0xe1   : > { %820 = vmatpush1.bf16.msra.mxu0 %v709_v25  ;;  %v5173_v57 = vld [vmem:[%s6064_s26 + $0x38] ss:$12 sps:$4 sm:$0xff]   ;;  %v5146_v58 = vld [vmem:[%s6064_s26 + $0x60] ss:$12 sps:$4 sm:$0xff]   ;;  %v5177_v59 = vld [vmem:[%s6064_s26 + $0x110] ss:$12 sps:$4 sm:$0xff]  }
  0xe2   : > { %899 = vmatprep.subr.bf16.mxu0 %v5125_v26  ;;  %v5152_v60 = vld [vmem:[%s6064_s26 + $0x7c] ss:$12 sps:$4 sm:$0xff]   ;;  %v5150_v63 = vld [vmem:[%s6064_s26 + $0x78] ss:$12 sps:$4 sm:$0xff]   ;;  %v5155_v1 = vld [vmem:[%s6064_s26 + $0x94] ss:$12 sps:$4 sm:$0xff]  }
  0xe3   : > { %861 = vmatpush1.bf16.msra.mxu1 %v715_v28  ;;  %v5178_v61 = vld [vmem:[%s6064_s26 + $0x50] ss:$12 sps:$4 sm:$0xff]   ;;  %v5182_v62 = vld [vmem:[%s6064_s26 + $0x128] ss:$12 sps:$4 sm:$0xff]   ;;  %v5187_v3 = vld [vmem:[%s6064_s26 + $0x140] ss:$12 sps:$4 sm:$0xff]  }
  0xe4   : > { %4265 = vmatmul.mubr.msk.bf16.vlgmr.msra.gmra.mrb[4].mxu0 %vm691_vm1, %v6091_v15  ;;  %940 = vmatprep.subr.bf16.mxu1 %v5130_v29  ;;  %v5183_v2 = vld [vmem:[%s6064_s26 + $0x68] ss:$12 sps:$4 sm:$0xff]   ;;  %v5153_v4 = vld [vmem:[%s6064_s26 + $0x90] ss:$12 sps:$4 sm:$0xff]   ;;  %v5158_v5 = vld [vmem:[%s6064_s26 + $0xac] ss:$12 sps:$4 sm:$0xff]   ;;  %v527_v29 = vlaneseq }
  0xe5   : > { %900 = vmatpush1.bf16.msra.mxu0 %v5123_v30  ;;  %931 = vmatprep.mubr.bf16.mxu0 %v5773_v0  ;;  %v5188_v6 = vld [vmem:[%s6064_s26 + $0x80] ss:$12 sps:$4 sm:$0xff]   ;;  %v5156_v7 = vld [vmem:[%s6064_s26 + $0xa8] ss:$12 sps:$4 sm:$0xff]   ;;  %v5161_v8 = vld [vmem:[%s6064_s26 + $0xc4] ss:$12 sps:$4 sm:$0xff]  }
  0xe6   : > { %4267 = vmatmul.mubr.msk.bf16.vlgmr.msra.gmra.mrb[4].mxu1 %vm691_vm1, %v6091_v15  ;;  %4268 = vmatprep.subr.msk.bf16.mxu0 %vm695_vm0, %v4256_v32  ;;  %v5159_v9 = vld [vmem:[%s6064_s26 + $0xc0] ss:$12 sps:$4 sm:$0xff]   ;;  %v5166_v10 = vld [vmem:[%s6064_s26 + $0xdc] ss:$12 sps:$4 sm:$0xff]   ;;  %v5164_v11 = vld [vmem:[%s6064_s26 + $0xd8] ss:$12 sps:$4 sm:$0xff]  }
  0xe7   : > { %941 = vmatpush1.bf16.msra.mxu1 %v5128_v34  ;;  %972 = vmatprep.mubr.bf16.mxu1 %v5773_v0  ;;  %v5171_v12 = vld [vmem:[%s6064_s26 + $0xf4] ss:$12 sps:$4 sm:$0xff]   ;;  %v5169_v13 = vld [vmem:[%s6064_s26 + $0xf0] ss:$12 sps:$4 sm:$0xff]   ;;  %v5176_v14 = vld [vmem:[%s6064_s26 + $0x10c] ss:$12 sps:$4 sm:$0xff]  }
  0xe8   : > { %4270 = vmatprep.subr.msk.bf16.mxu1 %vm695_vm0, %v4258_v35  ;;  %v5181_v16 = vld [vmem:[%s6064_s26 + $0x124] ss:$12 sps:$4 sm:$0xff]   ;;  %v5179_v17 = vld [vmem:[%s6064_s26 + $0x120] ss:$12 sps:$4 sm:$0xff]   ;;  %v5186_v18 = vld [vmem:[%s6064_s26 + $0x13c] ss:$12 sps:$4 sm:$0xff]  }
  0xe9   : > { %902 = vmatpush1.bf16.msra.mxu0 %v721_v37  ;;  %v5184_v19 = vld [vmem:[%s6064_s26 + $0x138] ss:$12 sps:$4 sm:$0xff]   ;;  %v5191_v20 = vld [vmem:[%s6064_s26 + $0x154] ss:$12 sps:$4 sm:$0xff]   ;;  %v5189_v22 = vld [vmem:[%s6064_s26 + $0x150] ss:$12 sps:$4 sm:$0xff]  }
  0xea   : > { %4981 = vmatprep.subr.bf16.mxu0 %v5774_v42  ;;  %v5192_v21 = vld [vmem:[%s6064_s26 + $0x158] ss:$12 sps:$4 sm:$0xff]   ;;  %v5197_v25 = vld [vmem:[%s6064_s26 + $0x170] ss:$12 sps:$4 sm:$0xff]   ;;  %v5194_v26 = vld [vmem:[%s6064_s26 + $0x168] ss:$12 sps:$4 sm:$0xff]  }
  0xeb   : > { %943 = vmatpush1.bf16.msra.mxu1 %v727_v38  ;;  %v5193_v23 = vld [vmem:[%s6064_s26 + $0x98] ss:$12 sps:$4 sm:$0xff]   ;;  %v5198_v27 = vld [vmem:[%s6064_s26 + $0xb0] ss:$12 sps:$4 sm:$0xff]   ;;  %v6184_v30 = vshrl.u32 %v527_v29, 7  ;;  %vm1760_vm7 = vcmask 359424  }
  0xec   : > { %4269 = vmatmul.mubr.msk.bf16.vlgmr.msra.gmra.mrb[8].mxu0 %vm691_vm1, %v6091_v15  ;;  %1559 = vmatprep.subr.bf16.mxu1 %v5135_v39  ;;  %v5196_v24 = vld [vmem:[%s6064_s26 + $0x16c] ss:$12 sps:$4 sm:$0xff]   ;;  %v5201_v28 = vld [vmem:[%s6064_s26 + $0x184] ss:$12 sps:$4 sm:$0xff]   ;;  %p491_p6 = scmp.lt.s32.totalorder %s5839_s28, 4  ;;  %s5779_s0 = smov 1  }
  0xed   : > { %4982 = vmatpush3.bf16.msra.mxu0 %v5145_v40  ;;  %4985 = vmatprep.mubr.msk.bf16.mxu0 %vm5775_vm2, %v5774_v42  ;;  %v6187_v31 = vsub.s32 0, %v6184_v30  ;;  %v6190_v32 = vld [vmem:[%s6062_s3] sm:$0xff]  ;;  %v6193_v33 = vsub.s32 1, %v6184_v30  ;;  %v6196_v34 = vsub.s32 3, %v6184_v30  ;;  %v6205_v41 = vsub.s32 4, %v6184_v30 }
  0xee   : > { %4271 = vmatmul.mubr.msk.bf16.vlgmr.msra.gmra.mrb[8].mxu1 %vm691_vm1, %v6091_v15  ;;  %4983 = vmatprep.subr.bf16.mxu0 %v5774_v42  ;;  %v5213_v29 = vld [vmem:[%s6064_s26 + $0x1cc] ss:$12 sps:$4 sm:$0xff]   ;;  %s6731_s28 = smov (!%p491_p6, %s5839_s28), 4  ;;  %vm4030_vm8 = vcmask 7168   ;;  %vm4032_vm9 = vcmask 15360  }
  0xef   : > { %1560 = vmatpush1.bf16.msra.mxu1 %v5133_v43  ;;  %v530_v35 = vrot.slane %v6190_v32, %v6187_v31  ;;  %v534_v36 = vrot.slane %v6190_v32, %v6193_v33  ;;  %v542_v38 = vrot.slane %v6190_v32, %v6196_v34  ;;  %s4232_s22 = sshll.u32 %s6731_s28, 2  ;;  %s4233_s30 = sshll.u32 %s6731_s28, 3 }
  0xf0   : > { %1561 = vmatprep.subr.bf16.mxu1 %v5138_v44  ;;  %s494_s13 = scalar_lea.vmem %s6700_s6, %s4232_s22  ;;  %s498_s8 = scalar_lea.vmem %s6701_s7, %s4233_s30 }
  0xf1   : > { %4984 = vmatpush3.bf16.msra.mxu0 %v733_v45  ;;  %v549_v45 = vsub.s32 5, %v6184_v30 }
  0xf2   : > { %4893 = vmatprep.subr.bf16.mxu0 %v5162_v46 }
  0xf3   : > { %1562 = vmatpush1.bf16.msra.mxu1 %v5136_v47 }
  0xf4   : > { %1563 = vmatprep.subr.bf16.mxu1 %v5141_v48  ;;  %4986 = vmatmul.mubr.msk.bf16.vlgmr.msra.gmra.mrb[12].mxu0 %vm691_vm1, %v6091_v15  ;;  %v5174_v15 = vld [vmem:[%s6064_s26 + $0x108] ss:$12 sps:$4 sm:$0xff]  }
  0xf5   : > { %4894 = vmatpush3.bf16.msra.mxu0 %v5163_v49  ;;  %v553_v49 = vsub.s32 6, %v6184_v30 }
  0xf6   : > { %4895 = vmatprep.subr.bf16.mxu0 %v5167_v50 }
  0xf7   : > { %1564 = vmatpush1.bf16.msra.mxu1 %v5139_v51 }
  0xf8   : > { %1565 = vmatprep.subr.bf16.mxu1 %v5144_v52 }
  0xf9   : > { %4896 = vmatpush3.bf16.msra.mxu0 %v5168_v53  ;;  %v557_v53 = vsub.s32 7, %v6184_v30 }
  0xfa   : > { %4897 = vmatprep.subr.bf16.mxu0 %v5172_v54  ;;  %v546_v54 = vrot.slane %v6190_v32, %v6205_v41 }
  0xfb   : > { %1566 = vmatpush1.bf16.msra.mxu1 %v5142_v55 }
  0xfc   : > { %1567 = vmatprep.subr.bf16.mxu1 %v5148_v56 }
  0xfd   : > { %4898 = vmatpush3.bf16.msra.mxu0 %v5173_v57 }
  0xfe   : > { %4899 = vmatprep.subr.bf16.mxu0 %v5177_v59  ;;  %v550_v59 = vrot.slane %v6190_v32, %v549_v45 }
  0xff   : > { %1568 = vmatpush1.bf16.msra.mxu1 %v5146_v58  ;;  %v5199_v58 = vld [vmem:[%s6064_s26 + $0x180] ss:$12 sps:$4 sm:$0xff]  }
 0x100   : > { %1569 = vmatprep.subr.bf16.mxu1 %v5152_v60  ;;  %v5202_v60 = vld [vmem:[%s6064_s26 + $0x188] ss:$12 sps:$4 sm:$0xff]  }
 0x101   : > { %4900 = vmatpush3.bf16.msra.mxu0 %v5178_v61 }
 0x102   : > { %4901 = vmatprep.subr.bf16.mxu0 %v5182_v62  ;;  %v554_v62 = vrot.slane %v6190_v32, %v553_v49 }
 0x103   : > { %1570 = vmatpush1.bf16.msra.mxu1 %v5150_v63  ;;  %v5205_v63 = vld [vmem:[%s6064_s26 + $0x19c] ss:$12 sps:$4 sm:$0xff]  }
 0x104   : > { %1571 = vmatprep.subr.bf16.mxu1 %v5155_v1 }
 0x105   : > { %4902 = vmatpush3.bf16.msra.mxu0 %v5183_v2 }
 0x106   : > { %4903 = vmatprep.subr.bf16.mxu0 %v5187_v3  ;;  %v558_v3 = vrot.slane %v6190_v32, %v557_v53 }
 0x107   : > { %1572 = vmatpush1.bf16.msra.mxu1 %v5153_v4 }
 0x108   : > { %1573 = vmatprep.subr.bf16.mxu1 %v5158_v5 }
 0x109   : > { %4904 = vmatpush3.bf16.msra.mxu0 %v5188_v6  ;;  %v5203_v6 = vld [vmem:[%s6064_s26 + $0x198] ss:$12 sps:$4 sm:$0xff]  }
 0x10a   : > { %4905 = vmatprep.subr.bf16.mxu0 %v5192_v21 }
 0x10b   : > { %1574 = vmatpush1.bf16.msra.mxu1 %v5156_v7 }
 0x10c   : > { %1575 = vmatprep.subr.bf16.mxu1 %v5161_v8 }
 0x10d   : > { %4906 = vmatpush3.bf16.msra.mxu0 %v5193_v23 }
 0x10e   : > { %4907 = vmatprep.subr.bf16.mxu0 %v5197_v25  ;;  %v5207_v25 = vld [vmem:[%s6064_s26 + $0x1b0] ss:$12 sps:$4 sm:$0xff]  }
 0x10f   : > { %1576 = vmatpush1.bf16.msra.mxu1 %v5159_v9 }
 0x110   : > { %1577 = vmatprep.subr.bf16.mxu1 %v5166_v10  ;;  %v5206_v10 = vld [vmem:[%s6064_s26 + $0x1a0] ss:$12 sps:$4 sm:$0xff]  }
 0x111   : > { %4908 = vmatpush3.bf16.msra.mxu0 %v5198_v27 }
 0x112   : > { %1681 = vmatprep.subr.bf16.mxu0 %v5773_v0 }
 0x113   : > { %1578 = vmatpush1.bf16.msra.mxu1 %v5164_v11  ;;  %v6229_v11 = vld [vmem:[%s6062_s3 + $0x8] sm:$0x1f] }
 0x114   : > { %1579 = vmatprep.subr.bf16.mxu1 %v5171_v12  ;;  %v562_v23 = vrot.slane %v6229_v11, %v6187_v31  ;;  %v566_v27 = vrot.slane %v6229_v11, %v6193_v33 }
 0x117   : > { %1580 = vmatpush1.bf16.msra.mxu1 %v5169_v13 }
 0x118   : > { %1581 = vmatprep.subr.bf16.mxu1 %v5176_v14 }
 0x11b   : > { %1582 = vmatpush1.bf16.msra.mxu1 %v5174_v15  ;;  %v5209_v15 = vld [vmem:[%s6064_s26 + $0x1b4] ss:$12 sps:$4 sm:$0xff]  }
 0x11c   : > { %1583 = vmatprep.subr.bf16.mxu1 %v5181_v16 }
 0x11f   : > { %1584 = vmatpush1.bf16.msra.mxu1 %v5179_v17 }
 0x120   : > { %1585 = vmatprep.subr.bf16.mxu1 %v5186_v18 }
 0x123   : > { %1586 = vmatpush1.bf16.msra.mxu1 %v5184_v19 }
 0x124   : > { %1587 = vmatprep.subr.bf16.mxu1 %v5191_v20 }
 0x127   : > { %1588 = vmatpush1.bf16.msra.mxu1 %v5189_v22 }
 0x128   : > { %1589 = vmatprep.subr.bf16.mxu1 %v5196_v24  ;;  %v6239_v24 = vsub.s32 2, %v6184_v30 }
 0x12b   : > { %1590 = vmatpush1.bf16.msra.mxu1 %v5194_v26  ;;  %v5210_v26 = vld [vmem:[%s6064_s26 + $0x1b8] ss:$12 sps:$4 sm:$0xff]  }
 0x12c   : > { %1600 = vmatprep.subr.bf16.mxu1 %v5201_v28 }
 0x1af   : > { %v769_v37 = vpop.f32.mrb[0].mxu0 }
 0x1b0   : > { %v770_v39 = vadd.f32 %v769_v37, %v530_v35  ;;  %v771_v40 = vpop.f32.mrb[1].mxu0  ;;  %v570_v37 = vrot.slane %v6229_v11, %v6239_v24 }
 0x1b1   : > { %v772_v42 = vadd.f32 %v771_v40, %v534_v36  ;;  %v773_v43 = vpop.f32.mrb[2].mxu0  ;;  %v6207_v44 = vpop.f32.mrb[0].mxu1 }
 0x1b2   : > { %v1021_v46 = vmax.f32 %v770_v39, 0.0  ;;  %v774_v47 = vpop.f32.mrb[3].mxu0  ;;  %v812_v48 = vpop.f32.mrb[1].mxu1  ;;  %v5214_v43 = vld [vmem:[%s6064_s26 + $0x1d0] ss:$12 sps:$4 sm:$0xff]  }
 0x1b3   : > { %v1022_v50 = vmax.f32 %v772_v42, 0.0  ;;  %v813_v51 = vadd.f32 %v812_v48, %v542_v38  ;;  %v814_v52 = vpop.f32.mrb[2].mxu1  ;;  %v5211_v42 = vld [vmem:[%s6064_s26 + $0x1c8] ss:$12 sps:$4 sm:$0xff]  }
 0x1b4   : > { %v815_v55 = vpop.f32.mrb[3].mxu1  ;;  %v1034_v61 = vpack.c.bf16 %v1021_v46, %v1021_v46 }
 0x1b5   : > { %v1035_v56 = vpack.c.bf16 %v1022_v50, %v1022_v50  ;;  %v1024_v57 = vmax.f32 %v813_v51, 0.0  ;;  %v5217_v50 = vld [vmem:[%s6064_s26 + $0x1e4] ss:$12 sps:$4 sm:$0xff]  }
 0x1b7   : > { %v1037_v1 = vpack.c.bf16 %v1024_v57, %v1024_v57  ;;  %v851_v2 = vpop.f32.mrb[4].mxu0  ;;  %1591 = vmatprep.mubr.bf16.mxu1 %v1035_v56  ;;  %1673 = vmatprep.mubr.bf16.mxu0 %v1035_v56 }
 0x1b8   : > { %v852_v4 = vadd.f32 %v851_v2, %v546_v54  ;;  %v853_v5 = vpop.f32.mrb[5].mxu0  ;;  %1592 = vmatmul.mubr.bf16.vlgmr.msra.gmra.mrb[12].mxu1 %v1034_v61  ;;  %1674 = vmatmul.mubr.bf16.vlgmr.msra.gmra.mrb[16].mxu0 %v1034_v61  ;;  %v5225_v2 = vld [vmem:[%s6064_s26 + $0x214] ss:$12 sps:$4 sm:$0xff]  }
 0x1b9   : > { %v854_v7 = vadd.f32 %v853_v5, %v550_v59  ;;  %1601 = vmatpush1.bf16.msra.mxu1 %v5199_v58  ;;  %1682 = vmatpush1.bf16.msra.mxu0 %v5202_v60  ;;  %v855_v8 = vpop.f32.mrb[6].mxu0  ;;  %v892_v9 = vpop.f32.mrb[4].mxu1  ;;  %v5215_v58 = vld [vmem:[%s6064_s26 + $0x1e0] ss:$12 sps:$4 sm:$0xff]   ;;  %v5218_v59 = vld [vmem:[%s6064_s26 + $0x1e8] ss:$12 sps:$4 sm:$0xff]  }
 0x1ba   : > { %v1025_v12 = vmax.f32 %v852_v4, 0.0  ;;  %v856_v13 = vpop.f32.mrb[7].mxu0  ;;  %v893_v14 = vadd.f32 %v892_v9, %v554_v62  ;;  %1602 = vmatprep.subr.bf16.mxu1 %v5205_v63  ;;  %1683 = vmatprep.subr.bf16.mxu0 %v5773_v0  ;;  %v894_v16 = vpop.f32.mrb[5].mxu1  ;;  %v5221_v60 = vld [vmem:[%s6064_s26 + $0x1fc] ss:$12 sps:$4 sm:$0xff]  }
 0x1bb   : > { %1897 = vrot.lane.b32.xlu1 %v1037_v1, %s5776_s10  ;;  %4348 = vmatprep.mubr.msk.bf16.mxu1 %vm1555_vm3, %v1037_v1  ;;  %v895_v17 = vadd.f32 %v894_v16, %v558_v3  ;;  %v896_v18 = vpop.f32.mrb[6].mxu1  ;;  %v1026_v19 = vmax.f32 %v854_v7, 0.0  ;;  %v5219_v63 = vld [vmem:[%s6064_s26 + $0x1f8] ss:$12 sps:$4 sm:$0xff]   ;;  %v5223_v4 = vld [vmem:[%s6064_s26 + $0x210] ss:$12 sps:$4 sm:$0xff]  }
 0x1bc   : > { %v1027_v20 = vmax.f32 %v893_v14, 0.0  ;;  %v1771_v21 = vpack.c.bf16 %v1025_v12, %v1025_v12  ;;  %4349 = vmatprep.mubr.msk.bf16.mxu0 %vm1555_vm3, %v1037_v1  ;;  %v897_v22 = vpop.f32.mrb[7].mxu1  ;;  %v5222_v1 = vld [vmem:[%s6064_s26 + $0x200] ss:$12 sps:$4 sm:$0xff]   ;;  %v5226_v5 = vld [vmem:[%s6064_s26 + $0x218] ss:$12 sps:$4 sm:$0xff]  }
 0x1bd   : > { %1603 = vmatpush1.bf16.msra.mxu1 %v5203_v6  ;;  %1684 = vmatpush1.bf16.msra.mxu0 %v5206_v10  ;;  %v1028_v35 = vmax.f32 %v895_v17, 0.0  ;;  %v1772_v38 = vpack.c.bf16 %v1026_v19, %v1026_v19  ;;  %v538_v6 = vrot.slane %v6190_v32, %v6239_v24  ;;  %v5229_v7 = vld [vmem:[%s6064_s26 + $0x22c] ss:$12 sps:$4 sm:$0xff]   ;;  %v5227_v8 = vld [vmem:[%s6064_s26 + $0x228] ss:$12 sps:$4 sm:$0xff]  }
 0x1be   : > { %v1773_v28 = vpack.c.bf16 %v1027_v20, %v1027_v20  ;;  %1899 = vrot.lane.b32.xlu0 %v1771_v21, %s5776_s10  ;;  %1604 = vmatprep.subr.bf16.mxu1 %v5209_v15  ;;  %v5230_v9 = vld [vmem:[%s6064_s26 + $0x230] ss:$12 sps:$4 sm:$0xff]   ;;  %v5231_v12 = vld [vmem:[%s6064_s26 + $0x240] ss:$12 sps:$4 sm:$0xff]   ;;  %v5234_v13 = vld [vmem:[%s6064_s26 + $0x248] ss:$12 sps:$4 sm:$0xff]  }
 0x1bf   : > { %1685 = vmatprep.subr.bf16.mxu0 %v5773_v0  ;;  %v933_v36 = vpop.f32.mrb[8].mxu0  ;;  %v2521_v54 = vpack.c.bf16 %v1028_v35, %v1028_v35  ;;  %v811_v10 = vadd.f32 %v6207_v44, %v538_v6  ;;  %v5233_v32 = vld [vmem:[%s6064_s26 + $0x244] ss:$12 sps:$4 sm:$0xff]   ;;  %v5237_v44 = vld [vmem:[%s6064_s26 + $0x25c] ss:$12 sps:$4 sm:$0xff]  }
 0x1c0   : > { %1903 = vrot.lane.b32.xlu1 %v1773_v28, %s5776_s10  ;;  %v934_v39 = vadd.f32 %v933_v36, %v562_v23  ;;  %v935_v40 = vpop.f32.mrb[9].mxu0  ;;  %v5262_v15 = vld [vmem:[%s6064_s26 + $0x320] ss:$12 sps:$4 sm:$0xff]   ;;  %v5235_v16 = vld [vmem:[%s6064_s26 + $0x258] ss:$12 sps:$4 sm:$0xff]   ;;  %v574_v23 = vrot.slane %v6229_v11, %v6196_v34  ;;  %v578_v36 = vrot.slane %v6229_v11, %v6205_v41 }
 0x1c1   : > { %1605 = vmatpush1.bf16.msra.mxu1 %v5207_v25  ;;  %1686 = vmatpush1.bf16.msra.mxu0 %v5210_v26  ;;  %v974_v46 = vpop.f32.mrb[8].mxu1  ;;  %v936_v47 = vadd.f32 %v935_v40, %v566_v27  ;;  %v937_v48 = vpop.f32.mrb[10].mxu0  ;;  %v1023_v14 = vmax.f32 %v811_v10, 0.0  ;;  %v5263_v17 = vld [vmem:[%s6064_s26 + $0x260] ss:$12 sps:$4 sm:$0xff]  }
 0x1c2   : > { %1901 = vrot.lane.b32.xlu0 %v1772_v38, %s5776_s10  ;;  %1606 = vmatprep.subr.bf16.mxu1 %v5213_v29  ;;  %v1029_v51 = vmax.f32 %v934_v39, 0.0  ;;  %v938_v52 = vpop.f32.mrb[11].mxu0  ;;  %v975_v55 = vadd.f32 %v974_v46, %v570_v37  ;;  %v5240_v19 = vld [vmem:[%s6064_s26 + $0x274] ss:$12 sps:$4 sm:$0xff]   ;;  %v5267_v20 = vld [vmem:[%s6064_s26 + $0x338] ss:$12 sps:$4 sm:$0xff]  }
 0x1c3   : > { %1687 = vmatprep.subr.bf16.mxu0 %v5773_v0  ;;  %v1030_v56 = vmax.f32 %v936_v47, 0.0  ;;  %v1036_v18 = vpack.c.bf16 %v1023_v14, %v1023_v14  ;;  %v5238_v21 = vld [vmem:[%s6064_s26 + $0x270] ss:$12 sps:$4 sm:$0xff]   ;;  %v5268_v22 = vld [vmem:[%s6064_s26 + $0x278] ss:$12 sps:$4 sm:$0xff]   ;;  %v976_v25 = vpop.f32.mrb[9].mxu1 }
 0x1c4   : > { %v2522_v57 = vpack.c.bf16 %v1029_v51, %v1029_v51  ;;  %v1031_v61 = vmax.f32 %v975_v55, 0.0  ;;  %v5243_v26 = vld [vmem:[%s6064_s26 + $0x28c] ss:$12 sps:$4 sm:$0xff]   ;;  %v5272_v27 = vld [vmem:[%s6064_s26 + $0x350] ss:$12 sps:$4 sm:$0xff]   ;;  %v977_v29 = vadd.f32 %v976_v25, %v574_v23 }
 0x1c5   : > { %1607 = vmatpush1.bf16.msra.mxu1 %v5211_v42  ;;  %1688 = vmatpush1.bf16.msra.mxu0 %v5214_v43  ;;  %v2523_v62 = vpack.c.bf16 %v1030_v56, %v1030_v56  ;;  %v5241_v38 = vld [vmem:[%s6064_s26 + $0x288] ss:$12 sps:$4 sm:$0xff]   ;;  %v5273_v39 = vld [vmem:[%s6064_s26 + $0x290] ss:$12 sps:$4 sm:$0xff]   ;;  %v5244_v52 = vld [vmem:[%s6064_s26 + $0x2a0] ss:$12 sps:$4 sm:$0xff]  }
 0x1c6   : > { %1608 = vmatprep.subr.bf16.mxu1 %v5217_v50  ;;  %1689 = vmatprep.subr.bf16.mxu0 %v5773_v0  ;;  %v3275_v3 = vpack.c.bf16 %v1031_v61, %v1031_v61  ;;  %v1032_v40 = vmax.f32 %v977_v29, 0.0  ;;  %v5246_v43 = vld [vmem:[%s6064_s26 + $0x2a4] ss:$12 sps:$4 sm:$0xff]   ;;  %v5277_v46 = vld [vmem:[%s6064_s26 + $0x368] ss:$12 sps:$4 sm:$0xff]  }
 0x1c7   : > { %2648 = vrot.lane.b32.xlu0 %v2521_v54, %s5777_s11  ;;  %2650 = vrot.lane.b32.xlu1 %v2522_v57, %s5777_s11  ;;  %v1015_v37 = vpop.f32.mrb[12].mxu0  ;;  %v5278_v54 = vld [vmem:[%s6064_s26 + $0x2a8] ss:$12 sps:$4 sm:$0xff]   ;;  %v5282_v56 = vld [vmem:[%s6064_s26 + $0x380] ss:$12 sps:$4 sm:$0xff]  }
 0x1c8   : > { %v4987_v42 = vpop.f32.mrb[13].mxu0  ;;  %v1016_v47 = vadd.f32 %v1015_v37, %v578_v36  ;;  %v3276_v50 = vpack.c.bf16 %v1032_v40, %v1032_v40  ;;  %v5249_v55 = vld [vmem:[%s6064_s26 + $0x2bc] ss:$12 sps:$4 sm:$0xff]   ;;  %v5287_v61 = vld [vmem:[%s6064_s26 + $0x398] ss:$12 sps:$4 sm:$0xff]  }
 0x1c9   : > { %1609 = vmatpush1.bf16.msra.mxu1 %v5215_v58  ;;  %1690 = vmatpush1.bf16.msra.mxu0 %v5218_v59  ;;  %v1018_v48 = vpop.f32.mrb[14].mxu0  ;;  %v5247_v58 = vld [vmem:[%s6064_s26 + $0x2b8] ss:$12 sps:$4 sm:$0xff]   ;;  %v5283_v59 = vld [vmem:[%s6064_s26 + $0x2c0] ss:$12 sps:$4 sm:$0xff]  }
 0x1ca   : > { %1610 = vmatprep.subr.bf16.mxu1 %v5221_v60  ;;  %1691 = vmatprep.subr.bf16.mxu0 %v5773_v0  ;;  %v4988_v11 = vpop.f32.mrb[15].mxu0  ;;  %v1033_v51 = vmax.f32 %v1016_v47, 0.0  ;;  %v5252_v60 = vld [vmem:[%s6064_s26 + $0x2d4] ss:$12 sps:$4 sm:$0xff]   ;;  %v5259_v10 = vld [vmem:[%s6064_s26 + $0x318] ss:$12 sps:$4 sm:$0xff]  }
 0x1cb   : > { %2646 = vrot.lane.b32.xlu0 %v1773_v28, %s5777_s11  ;;  %2652 = vrot.lane.b32.xlu1 %v2523_v62, %s5777_s11  ;;  %v978_v28 = vpop.f32.mrb[10].mxu1  ;;  %v5297_v6 = vld [vmem:[%s6064_s26 + $0x3c8] ss:$12 sps:$4 sm:$0xff]   ;;  %v5294_v23 = vld [vmem:[%s6064_s26 + $0x3c0] ss:$12 sps:$4 sm:$0xff]  }
 0x1cc   : > { %v979_v35 = vpop.f32.mrb[11].mxu1  ;;  %v3277_v57 = vpack.c.bf16 %v1033_v51, %v1033_v51  ;;  %v5269_v14 = vld [vmem:[%s6064_s26 + $0x348] ss:$12 sps:$4 sm:$0xff]   ;;  %v5299_v29 = vld [vmem:[%s6064_s26 + $0x3d8] ss:$12 sps:$4 sm:$0xff]  }
 0x1cd   : > { %1611 = vmatpush1.bf16.msra.mxu1 %v5219_v63  ;;  %1692 = vmatpush1.bf16.msra.mxu0 %v5222_v1  ;;  %v5288_v63 = vld [vmem:[%s6064_s26 + $0x2d8] ss:$12 sps:$4 sm:$0xff]   ;;  %v5301_v25 = vld [vmem:[%s6064_s26 + $0x3dc] ss:$12 sps:$4 sm:$0xff]   ;;  %v5302_v35 = vld [vmem:[%s6064_s26 + $0x3e0] ss:$12 sps:$4 sm:$0xff]  }
 0x1ce   : > { %1612 = vmatprep.subr.bf16.mxu1 %v5225_v2  ;;  %1693 = vmatprep.subr.bf16.mxu0 %v5773_v0  ;;  %v5255_v1 = vld [vmem:[%s6064_s26 + $0x2ec] ss:$12 sps:$4 sm:$0xff]   ;;  %v5292_v2 = vld [vmem:[%s6064_s26 + $0x3b0] ss:$12 sps:$4 sm:$0xff]   ;;  %v5307_v47 = vld [vmem:[%s6064_s26 + $0x408] ss:$12 sps:$4 sm:$0xff]  }
 0x1cf   : > { %3402 = vrot.lane.b32.xlu0 %v3275_v3, %s5778_s19  ;;  %3404 = vrot.lane.b32.xlu1 %v3276_v50, %s5778_s19  ;;  %v5253_v3 = vld [vmem:[%s6064_s26 + $0x2e8] ss:$12 sps:$4 sm:$0xff]   ;;  %v5303_v40 = vld [vmem:[%s6064_s26 + $0x3f0] ss:$12 sps:$4 sm:$0xff]  }
 0x1d0   : > { %v5306_v42 = vld [vmem:[%s6064_s26 + $0x3f8] ss:$12 sps:$4 sm:$0xff]   ;;  %v5310_v48 = vld [vmem:[%s6064_s26 + $0x410] ss:$12 sps:$4 sm:$0xff]  }
 0x1d1   : > { %1613 = vmatpush1.bf16.msra.mxu1 %v5223_v4  ;;  %1694 = vmatpush1.bf16.msra.mxu0 %v5226_v5  ;;  %v5293_v4 = vld [vmem:[%s6064_s26 + $0x2f0] ss:$12 sps:$4 sm:$0xff]  }
 0x1d2   : > { %1614 = vmatprep.subr.bf16.mxu1 %v5229_v7  ;;  %1695 = vmatprep.subr.bf16.mxu0 %v5773_v0  ;;  %v5258_v5 = vld [vmem:[%s6064_s26 + $0x304] ss:$12 sps:$4 sm:$0xff]   ;;  %v5256_v7 = vld [vmem:[%s6064_s26 + $0x300] ss:$12 sps:$4 sm:$0xff]  }
 0x1d3   : > { %3400 = vrot.lane.b32.xlu0 %v2523_v62, %s5778_s19  ;;  %3406 = vrot.lane.b32.xlu1 %v3277_v57, %s5778_s19  ;;  %v5250_v62 = vld [vmem:[%s6064_s26 + $0x2d0] ss:$12 sps:$4 sm:$0xff]   ;;  %v5318_v57 = vld [vmem:[%s6064_s26 + $0x440] ss:$12 sps:$4 sm:$0xff]  }
 0x1d4   : > { %v5313_v50 = vld [vmem:[%s6064_s26 + $0x424] ss:$12 sps:$4 sm:$0xff]  }
 0x1d5   : > { %1615 = vmatpush1.bf16.msra.mxu1 %v5227_v8  ;;  %1696 = vmatpush1.bf16.msra.mxu0 %v5230_v9  ;;  %v5298_v8 = vld [vmem:[%s6064_s26 + $0x308] ss:$12 sps:$4 sm:$0xff]  }
 0x1d6   : > { %1616 = vmatprep.subr.bf16.mxu1 %v5233_v32  ;;  %1697 = vmatprep.subr.bf16.mxu0 %v5773_v0  ;;  %v5261_v9 = vld [vmem:[%s6064_s26 + $0x31c] ss:$12 sps:$4 sm:$0xff]   ;;  %v5266_v32 = vld [vmem:[%s6064_s26 + $0x334] ss:$12 sps:$4 sm:$0xff]  }
 0x1d9   : > { %1617 = vmatpush1.bf16.msra.mxu1 %v5231_v12  ;;  %1698 = vmatpush1.bf16.msra.mxu0 %v5234_v13  ;;  %v5264_v12 = vld [vmem:[%s6064_s26 + $0x330] ss:$12 sps:$4 sm:$0xff]   ;;  %v5271_v13 = vld [vmem:[%s6064_s26 + $0x34c] ss:$12 sps:$4 sm:$0xff]  }
 0x1da   : > { %2315 = vmatprep.subr.bf16.mxu0 %v5237_v44  ;;  %4915 = vmatprep.subr.bf16.mxu1 %v5262_v15  ;;  %v5276_v44 = vld [vmem:[%s6064_s26 + $0x364] ss:$12 sps:$4 sm:$0xff]   ;;  %v5274_v15 = vld [vmem:[%s6064_s26 + $0x360] ss:$12 sps:$4 sm:$0xff]  }
 0x1dc   : > { %1633 = vmatmul.mubr.bf16.vlgmr.msra.gmra.mrb[12].mxu1 %v1036_v18  ;;  %1714 = vmatmul.mubr.bf16.vlgmr.msra.gmra.mrb[20].mxu0 %v1036_v18  ;;  %v5286_v18 = vld [vmem:[%s6064_s26 + $0x394] ss:$12 sps:$4 sm:$0xff]  }
 0x1dd   : > { %2316 = vmatpush1.bf16.msra.mxu0 %v5235_v16  ;;  %4916 = vmatpush3.bf16.msra.mxu1 %v5263_v17  ;;  %v5281_v16 = vld [vmem:[%s6064_s26 + $0x37c] ss:$12 sps:$4 sm:$0xff]   ;;  %v5279_v17 = vld [vmem:[%s6064_s26 + $0x378] ss:$12 sps:$4 sm:$0xff]  }
 0x1de   : > { %2317 = vmatprep.subr.bf16.mxu0 %v5240_v19  ;;  %4917 = vmatprep.subr.bf16.mxu1 %v5267_v20  ;;  %v5284_v19 = vld [vmem:[%s6064_s26 + $0x390] ss:$12 sps:$4 sm:$0xff]   ;;  %v5291_v20 = vld [vmem:[%s6064_s26 + $0x3ac] ss:$12 sps:$4 sm:$0xff]  }
 0x1e1   : > { %2318 = vmatpush1.bf16.msra.mxu0 %v5238_v21  ;;  %4918 = vmatpush3.bf16.msra.mxu1 %v5268_v22  ;;  %v5289_v21 = vld [vmem:[%s6064_s26 + $0x3a8] ss:$12 sps:$4 sm:$0xff]   ;;  %v5296_v22 = vld [vmem:[%s6064_s26 + $0x3c4] ss:$12 sps:$4 sm:$0xff]  }
 0x1e2   : > { %2319 = vmatprep.subr.bf16.mxu0 %v5243_v26  ;;  %4919 = vmatprep.subr.bf16.mxu1 %v5272_v27 }
 0x1e5   : > { %2320 = vmatpush1.bf16.msra.mxu0 %v5241_v38  ;;  %4920 = vmatpush3.bf16.msra.mxu1 %v5273_v39  ;;  %v5305_v38 = vld [vmem:[%s6064_s26 + $0x3f4] ss:$12 sps:$4 sm:$0xff]  }
 0x1e6   : > { %2321 = vmatprep.subr.bf16.mxu0 %v5246_v43  ;;  %4921 = vmatprep.subr.bf16.mxu1 %v5277_v46  ;;  %v5309_v43 = vld [vmem:[%s6064_s26 + $0x40c] ss:$12 sps:$4 sm:$0xff]  }
 0x1e9   : > { %2322 = vmatpush1.bf16.msra.mxu0 %v5244_v52  ;;  %4922 = vmatpush3.bf16.msra.mxu1 %v5278_v54  ;;  %v5311_v52 = vld [vmem:[%s6064_s26 + $0x420] ss:$12 sps:$4 sm:$0xff]   ;;  %v5314_v54 = vld [vmem:[%s6064_s26 + $0x428] ss:$12 sps:$4 sm:$0xff]  }
 0x1ea   : > { %2323 = vmatprep.subr.bf16.mxu0 %v5249_v55  ;;  %4923 = vmatprep.subr.bf16.mxu1 %v5282_v56  ;;  %v5317_v55 = vld [vmem:[%s6064_s26 + $0x43c] ss:$12 sps:$4 sm:$0xff]   ;;  %v5315_v56 = vld [vmem:[%s6064_s26 + $0x438] ss:$12 sps:$4 sm:$0xff]  }
 0x1ed   : > { %2324 = vmatpush1.bf16.msra.mxu0 %v5247_v58  ;;  %4924 = vmatpush3.bf16.msra.mxu1 %v5283_v59  ;;  %v5321_v58 = vld [vmem:[%s6064_s26 + $0x454] ss:$12 sps:$4 sm:$0xff]   ;;  %v5319_v59 = vld [vmem:[%s6064_s26 + $0x450] ss:$12 sps:$4 sm:$0xff]  }
 0x1ee   : > { %2325 = vmatprep.subr.bf16.mxu0 %v5252_v60  ;;  %4925 = vmatprep.subr.bf16.mxu1 %v5287_v61  ;;  %v5322_v60 = vld [vmem:[%s6064_s26 + $0x458] ss:$12 sps:$4 sm:$0xff]  }
 0x1ef   : > { %v5325_v61 = vld [vmem:[%s6064_s26 + $0x46c] ss:$12 sps:$4 sm:$0xff]  }
 0x1f1   : > { %2326 = vmatpush1.bf16.msra.mxu0 %v5250_v62  ;;  %4926 = vmatpush3.bf16.msra.mxu1 %v5288_v63  ;;  %v5323_v62 = vld [vmem:[%s6064_s26 + $0x468] ss:$12 sps:$4 sm:$0xff]   ;;  %v5326_v63 = vld [vmem:[%s6064_s26 + $0x470] ss:$12 sps:$4 sm:$0xff]  }
 0x1f2   : > { %2327 = vmatprep.subr.bf16.mxu0 %v5255_v1  ;;  %4927 = vmatprep.subr.bf16.mxu1 %v5292_v2  ;;  %v5329_v1 = vld [vmem:[%s6064_s26 + $0x484] ss:$12 sps:$4 sm:$0xff]   ;;  %v5327_v2 = vld [vmem:[%s6064_s26 + $0x480] ss:$12 sps:$4 sm:$0xff]  }
 0x1f5   : > { %2328 = vmatpush1.bf16.msra.mxu0 %v5253_v3  ;;  %4928 = vmatpush3.bf16.msra.mxu1 %v5293_v4  ;;  %v5330_v3 = vld [vmem:[%s6064_s26 + $0x488] ss:$12 sps:$4 sm:$0xff]  }
 0x1f6   : > { %2329 = vmatprep.subr.bf16.mxu0 %v5258_v5  ;;  %4929 = vmatprep.subr.bf16.mxu1 %v5297_v6  ;;  %v5333_v4 = vld [vmem:[%s6064_s26 + $0x49c] ss:$12 sps:$4 sm:$0xff]   ;;  %v5331_v5 = vld [vmem:[%s6064_s26 + $0x498] ss:$12 sps:$4 sm:$0xff]   ;;  %v5334_v6 = vld [vmem:[%s6064_s26 + $0x4a0] ss:$12 sps:$4 sm:$0xff]  }
 0x1f9   : > { %2330 = vmatpush1.bf16.msra.mxu0 %v5256_v7  ;;  %4930 = vmatpush3.bf16.msra.mxu1 %v5298_v8  ;;  %v5337_v7 = vld [vmem:[%s6064_s26 + $0x4b4] ss:$12 sps:$4 sm:$0xff]   ;;  %v5338_v8 = vld [vmem:[%s6064_s26 + $0x578] ss:$12 sps:$4 sm:$0xff]  }
 0x1fa   : > { %2331 = vmatprep.subr.bf16.mxu0 %v5261_v9  ;;  %2437 = vmatprep.subr.bf16.mxu1 %v5773_v0  ;;  %v5335_v9 = vld [vmem:[%s6064_s26 + $0x4b0] ss:$12 sps:$4 sm:$0xff]  }
 0x1fd   : > { %2332 = vmatpush1.bf16.msra.mxu0 %v5259_v10  ;;  %v5339_v10 = vld [vmem:[%s6064_s26 + $0x4b8] ss:$12 sps:$4 sm:$0xff]  }
 0x1fe   : > { %2333 = vmatprep.subr.bf16.mxu0 %v5266_v32 }
 0x201   : > { %2334 = vmatpush1.bf16.msra.mxu0 %v5264_v12 }
 0x202   : > { %2335 = vmatprep.subr.bf16.mxu0 %v5271_v13 }
 0x205   : > { %2336 = vmatpush1.bf16.msra.mxu0 %v5269_v14 }
 0x206   : > { %2337 = vmatprep.subr.bf16.mxu0 %v5276_v44  ;;  %v5342_v44 = vld [vmem:[%s6064_s26 + $0x4cc] ss:$12 sps:$4 sm:$0xff]  }
 0x209   : > { %2338 = vmatpush1.bf16.msra.mxu0 %v5274_v15  ;;  %v5343_v15 = vld [vmem:[%s6064_s26 + $0x590] ss:$12 sps:$4 sm:$0xff]  }
 0x20a   : > { %2339 = vmatprep.subr.bf16.mxu0 %v5281_v16  ;;  %v5340_v16 = vld [vmem:[%s6064_s26 + $0x4c8] ss:$12 sps:$4 sm:$0xff]  }
 0x20d   : > { %2340 = vmatpush1.bf16.msra.mxu0 %v5279_v17  ;;  %v5344_v17 = vld [vmem:[%s6064_s26 + $0x4d0] ss:$12 sps:$4 sm:$0xff]  }
 0x20e   : > { %2341 = vmatprep.subr.bf16.mxu0 %v5286_v18  ;;  %v5347_v18 = vld [vmem:[%s6064_s26 + $0x4e4] ss:$12 sps:$4 sm:$0xff]  }
 0x211   : > { %2342 = vmatpush1.bf16.msra.mxu0 %v5284_v19  ;;  %v5348_v19 = vld [vmem:[%s6064_s26 + $0x5a8] ss:$12 sps:$4 sm:$0xff]  }
 0x212   : > { %2343 = vmatprep.subr.bf16.mxu0 %v5291_v20 }
 0x215   : > { %2344 = vmatpush1.bf16.msra.mxu0 %v5289_v21 }
 0x216   : > { %2345 = vmatprep.subr.bf16.mxu0 %v5296_v22  ;;  %v5345_v22 = vld [vmem:[%s6064_s26 + $0x4e0] ss:$12 sps:$4 sm:$0xff]  }
 0x219   : > { %2346 = vmatpush1.bf16.msra.mxu0 %v5294_v23  ;;  %v5349_v23 = vld [vmem:[%s6064_s26 + $0x4e8] ss:$12 sps:$4 sm:$0xff]  }
 0x21a   : > { %2356 = vmatprep.subr.bf16.mxu0 %v5301_v25  ;;  %v5352_v25 = vld [vmem:[%s6064_s26 + $0x4fc] ss:$12 sps:$4 sm:$0xff]  }
 0x22d   : > { %v1898_v26 = vpop.permute.xlu1 %1897 }
 0x230   : > { %v1900_v27 = vpop.permute.xlu0 %1899 }
 0x231   : > { %v1906_v39 = vsel %vm1905_vm4, %v1898_v26, %v1900_v27  ;;  %v5353_v26 = vld [vmem:[%s6064_s26 + $0x5c0] ss:$12 sps:$4 sm:$0xff]  }
 0x232   : > { %v6340_v36 = vpop.permute.xlu1 %1903 }
 0x234   : > { %v6336_v28 = vpop.permute.xlu0 %1901 }
 0x235   : > { %v1907_v37 = vsel %vm1905_vm4, %v1900_v27, %v6336_v28  ;;  %v1908_v13 = vsel %vm1905_vm4, %v6336_v28, %v6340_v36  ;;  %v5350_v27 = vld [vmem:[%s6064_s26 + $0x4f8] ss:$12 sps:$4 sm:$0xff]   ;;  %v5354_v28 = vld [vmem:[%s6064_s26 + $0x500] ss:$12 sps:$4 sm:$0xff]  }
 0x236   : > { %2347 = vmatprep.mubr.bf16.mxu0 %v1907_v37  ;;  %2429 = vmatprep.mubr.bf16.mxu1 %v1907_v37  ;;  %v5359_v37 = vld [vmem:[%s6064_s26 + $0x518] ss:$12 sps:$4 sm:$0xff]  }
 0x237   : > { %2348 = vmatmul.mubr.bf16.vlgmr.msra.gmra.mrb[24].mxu0 %v1906_v39  ;;  %2430 = vmatmul.mubr.bf16.vlgmr.msra.gmra.mrb[16].mxu1 %v1906_v39  ;;  %v5363_v39 = vld [vmem:[%s6064_s26 + $0x5f0] ss:$12 sps:$4 sm:$0xff]  }
 0x238   : > { %2357 = vmatpush1.bf16.msra.mxu0 %v5299_v29  ;;  %2438 = vmatpush1.bf16.msra.mxu1 %v5302_v35  ;;  %v5357_v29 = vld [vmem:[%s6064_s26 + $0x514] ss:$12 sps:$4 sm:$0xff]   ;;  %v5358_v35 = vld [vmem:[%s6064_s26 + $0x5d8] ss:$12 sps:$4 sm:$0xff]  }
 0x239   : > { %2358 = vmatprep.subr.bf16.mxu0 %v5305_v38  ;;  %2439 = vmatprep.subr.bf16.mxu1 %v5773_v0  ;;  %v6350_v46 = vpop.permute.xlu1 %2650  ;;  %v6394_v32 = vpop.permute.xlu0 %2648  ;;  %v5362_v38 = vld [vmem:[%s6064_s26 + $0x52c] ss:$12 sps:$4 sm:$0xff]  }
 0x23a   : > { %4527 = vmatprep.mubr.msk.bf16.mxu0 %vm1555_vm3, %v6340_v36  ;;  %4528 = vmatprep.mubr.msk.bf16.mxu1 %vm1555_vm3, %v6340_v36  ;;  %v2656_v14 = vsel %vm2654_vm5, %v6394_v32, %v6350_v46  ;;  %v5355_v36 = vld [vmem:[%s6064_s26 + $0x510] ss:$12 sps:$4 sm:$0xff]  }
 0x23c   : > { %2359 = vmatpush1.bf16.msra.mxu0 %v5303_v40  ;;  %2440 = vmatpush1.bf16.msra.mxu1 %v5306_v42  ;;  %v5360_v40 = vld [vmem:[%s6064_s26 + $0x528] ss:$12 sps:$4 sm:$0xff]   ;;  %v5364_v42 = vld [vmem:[%s6064_s26 + $0x530] ss:$12 sps:$4 sm:$0xff]  }
 0x23d   : > { %2360 = vmatprep.subr.bf16.mxu0 %v5309_v43  ;;  %2441 = vmatprep.subr.bf16.mxu1 %v5773_v0  ;;  %v6360_v11 = vpop.permute.xlu1 %2652  ;;  %v5367_v43 = vld [vmem:[%s6064_s26 + $0x544] ss:$12 sps:$4 sm:$0xff]  }
 0x23e   : > { %v6365_v51 = vsel %vm2654_vm5, %v6350_v46, %v6360_v11  ;;  %v5368_v46 = vld [vmem:[%s6064_s26 + $0x608] ss:$12 sps:$4 sm:$0xff]  }
 0x240   : > { %2361 = vmatpush1.bf16.msra.mxu0 %v5307_v47  ;;  %2442 = vmatpush1.bf16.msra.mxu1 %v5310_v48  ;;  %v5365_v47 = vld [vmem:[%s6064_s26 + $0x540] ss:$12 sps:$4 sm:$0xff]   ;;  %v5369_v48 = vld [vmem:[%s6064_s26 + $0x548] ss:$12 sps:$4 sm:$0xff]  }
 0x241   : > { %2362 = vmatprep.subr.bf16.mxu0 %v5313_v50  ;;  %2443 = vmatprep.subr.bf16.mxu1 %v5773_v0  ;;  %v6396_v12 = vpop.permute.xlu1 %3404  ;;  %v5372_v50 = vld [vmem:[%s6064_s26 + $0x55c] ss:$12 sps:$4 sm:$0xff]  }
 0x244   : > { %2363 = vmatpush1.bf16.msra.mxu0 %v5311_v52  ;;  %2444 = vmatpush1.bf16.msra.mxu1 %v5314_v54  ;;  %v5373_v52 = vld [vmem:[%s6064_s26 + $0x620] ss:$12 sps:$4 sm:$0xff]   ;;  %v5370_v54 = vld [vmem:[%s6064_s26 + $0x558] ss:$12 sps:$4 sm:$0xff]  }
 0x245   : > { %2364 = vmatprep.subr.bf16.mxu0 %v5317_v55  ;;  %2445 = vmatprep.subr.bf16.mxu1 %v5773_v0  ;;  %v6410_v20 = vpop.permute.xlu1 %3406  ;;  %v5374_v55 = vld [vmem:[%s6064_s26 + $0x560] ss:$12 sps:$4 sm:$0xff]  }
 0x246   : > { %v6415_v21 = vsel %vm3408_vm6, %v6396_v12, %v6410_v20 }
 0x248   : > { %2365 = vmatpush1.bf16.msra.mxu0 %v5315_v56  ;;  %2446 = vmatpush1.bf16.msra.mxu1 %v5318_v57  ;;  %v5377_v56 = vld [vmem:[%s6064_s26 + $0x574] ss:$12 sps:$4 sm:$0xff]   ;;  %v2647_v57 = vpop.permute.xlu0 %2646 }
 0x249   : > { %2366 = vmatprep.subr.bf16.mxu0 %v5321_v58  ;;  %2447 = vmatprep.subr.bf16.mxu1 %v5773_v0  ;;  %v5375_v58 = vld [vmem:[%s6064_s26 + $0x570] ss:$12 sps:$4 sm:$0xff]  }
 0x24c   : > { %2367 = vmatpush1.bf16.msra.mxu0 %v5319_v59  ;;  %2448 = vmatpush1.bf16.msra.mxu1 %v5322_v60  ;;  %v5378_v59 = vld [vmem:[%s6064_s26 + $0x638] ss:$12 sps:$4 sm:$0xff]  }
 0x24d   : > { %2368 = vmatprep.subr.bf16.mxu0 %v5325_v61  ;;  %2449 = vmatprep.subr.bf16.mxu1 %v5773_v0  ;;  %v5381_v60 = vld [vmem:[%s6064_s26 + $0x58c] ss:$12 sps:$4 sm:$0xff]   ;;  %v6446_v61 = vsel %vm2654_vm5, %v2647_v57, %v6394_v32 }
 0x250   : > { %2369 = vmatpush1.bf16.msra.mxu0 %v5323_v62  ;;  %2450 = vmatpush1.bf16.msra.mxu1 %v5326_v63  ;;  %v5379_v62 = vld [vmem:[%s6064_s26 + $0x588] ss:$12 sps:$4 sm:$0xff]   ;;  %v5382_v63 = vld [vmem:[%s6064_s26 + $0x650] ss:$12 sps:$4 sm:$0xff]  }
 0x251   : > { %2370 = vmatprep.subr.bf16.mxu0 %v5329_v1  ;;  %2451 = vmatprep.subr.bf16.mxu1 %v5773_v0  ;;  %v5385_v1 = vld [vmem:[%s6064_s26 + $0x5a4] ss:$12 sps:$4 sm:$0xff]  }
 0x254   : > { %2371 = vmatpush1.bf16.msra.mxu0 %v5327_v2  ;;  %2452 = vmatpush1.bf16.msra.mxu1 %v5330_v3  ;;  %v5383_v2 = vld [vmem:[%s6064_s26 + $0x5a0] ss:$12 sps:$4 sm:$0xff]   ;;  %v5386_v3 = vld [vmem:[%s6064_s26 + $0x668] ss:$12 sps:$4 sm:$0xff]  }
 0x255   : > { %2372 = vmatprep.subr.bf16.mxu0 %v5333_v4  ;;  %2453 = vmatprep.subr.bf16.mxu1 %v5773_v0  ;;  %v5389_v4 = vld [vmem:[%s6064_s26 + $0x5bc] ss:$12 sps:$4 sm:$0xff]  }
 0x258   : > { %2373 = vmatpush1.bf16.msra.mxu0 %v5331_v5  ;;  %2454 = vmatpush1.bf16.msra.mxu1 %v5334_v6  ;;  %v5387_v5 = vld [vmem:[%s6064_s26 + $0x5b8] ss:$12 sps:$4 sm:$0xff]   ;;  %v5390_v6 = vld [vmem:[%s6064_s26 + $0x680] ss:$12 sps:$4 sm:$0xff]  }
 0x259   : > { %3064 = vmatprep.subr.bf16.mxu1 %v5337_v7  ;;  %4937 = vmatprep.subr.bf16.mxu0 %v5338_v8  ;;  %v5393_v7 = vld [vmem:[%s6064_s26 + $0x5d4] ss:$12 sps:$4 sm:$0xff]   ;;  %v5391_v8 = vld [vmem:[%s6064_s26 + $0x5d0] ss:$12 sps:$4 sm:$0xff]  }
 0x25b   : > { %2389 = vmatmul.mubr.bf16.vlgmr.msra.gmra.mrb[24].mxu0 %v1908_v13  ;;  %2470 = vmatmul.mubr.bf16.vlgmr.msra.gmra.mrb[20].mxu1 %v1908_v13 }
 0x25c   : > { %3065 = vmatpush1.bf16.msra.mxu1 %v5335_v9  ;;  %4938 = vmatpush3.bf16.msra.mxu0 %v5339_v10  ;;  %v5394_v9 = vld [vmem:[%s6064_s26 + $0x698] ss:$12 sps:$4 sm:$0xff]  }
 0x25d   : > { %3096 = vmatprep.mubr.bf16.mxu1 %v2656_v14  ;;  %3178 = vmatprep.mubr.bf16.mxu0 %v2656_v14  ;;  %v5397_v10 = vld [vmem:[%s6064_s26 + $0x5ec] ss:$12 sps:$4 sm:$0xff]   ;;  %v5395_v14 = vld [vmem:[%s6064_s26 + $0x5e8] ss:$12 sps:$4 sm:$0xff]  }
 0x25e   : > { %3066 = vmatprep.subr.bf16.mxu1 %v5342_v44  ;;  %4939 = vmatprep.subr.bf16.mxu0 %v5343_v15  ;;  %v5398_v44 = vld [vmem:[%s6064_s26 + $0x6b0] ss:$12 sps:$4 sm:$0xff]  }
 0x260   : > { %3067 = vmatpush1.bf16.msra.mxu1 %v5340_v16  ;;  %4940 = vmatpush3.bf16.msra.mxu0 %v5344_v17  ;;  %v5401_v17 = vld [vmem:[%s6064_s26 + $0x604] ss:$12 sps:$4 sm:$0xff]  }
 0x261   : > { %3068 = vmatprep.subr.bf16.mxu1 %v5347_v18  ;;  %4941 = vmatprep.subr.bf16.mxu0 %v5348_v19  ;;  %v5399_v19 = vld [vmem:[%s6064_s26 + $0x600] ss:$12 sps:$4 sm:$0xff]  }
 0x264   : > { %3069 = vmatpush1.bf16.msra.mxu1 %v5345_v22  ;;  %4942 = vmatpush3.bf16.msra.mxu0 %v5349_v23  ;;  %v5402_v22 = vld [vmem:[%s6064_s26 + $0x6c8] ss:$12 sps:$4 sm:$0xff]  }
 0x265   : > { %3070 = vmatprep.subr.bf16.mxu1 %v5352_v25  ;;  %4943 = vmatprep.subr.bf16.mxu0 %v5353_v26  ;;  %v5405_v23 = vld [vmem:[%s6064_s26 + $0x61c] ss:$12 sps:$4 sm:$0xff]   ;;  %v5403_v25 = vld [vmem:[%s6064_s26 + $0x618] ss:$12 sps:$4 sm:$0xff]   ;;  %v5406_v26 = vld [vmem:[%s6064_s26 + $0x6e0] ss:$12 sps:$4 sm:$0xff]  }
 0x268   : > { %3071 = vmatpush1.bf16.msra.mxu1 %v5350_v27  ;;  %4944 = vmatpush3.bf16.msra.mxu0 %v5354_v28  ;;  %v5409_v27 = vld [vmem:[%s6064_s26 + $0x634] ss:$12 sps:$4 sm:$0xff]   ;;  %v5407_v28 = vld [vmem:[%s6064_s26 + $0x630] ss:$12 sps:$4 sm:$0xff]  }
 0x269   : > { %3072 = vmatprep.subr.bf16.mxu1 %v5357_v29  ;;  %4945 = vmatprep.subr.bf16.mxu0 %v5358_v35  ;;  %v5410_v29 = vld [vmem:[%s6064_s26 + $0x6f8] ss:$12 sps:$4 sm:$0xff]  }
 0x26a   : > { %v5413_v35 = vld [vmem:[%s6064_s26 + $0x64c] ss:$12 sps:$4 sm:$0xff]  }
 0x26c   : > { %3073 = vmatpush1.bf16.msra.mxu1 %v5355_v36  ;;  %4946 = vmatpush3.bf16.msra.mxu0 %v5359_v37  ;;  %v5416_v36 = vld [vmem:[%s6064_s26 + $0x70c] ss:$12 sps:$4 sm:$0xff]   ;;  %v5411_v37 = vld [vmem:[%s6064_s26 + $0x648] ss:$12 sps:$4 sm:$0xff]  }
 0x26d   : > { %3074 = vmatprep.subr.bf16.mxu1 %v5362_v38  ;;  %4947 = vmatprep.subr.bf16.mxu0 %v5363_v39  ;;  %v5414_v38 = vld [vmem:[%s6064_s26 + $0x708] ss:$12 sps:$4 sm:$0xff]   ;;  %v5419_v39 = vld [vmem:[%s6064_s26 + $0x664] ss:$12 sps:$4 sm:$0xff]  }
 0x270   : > { %3075 = vmatpush1.bf16.msra.mxu1 %v5360_v40  ;;  %4948 = vmatpush3.bf16.msra.mxu0 %v5364_v42  ;;  %v6492_v40 = vpop.permute.xlu0 %3402  ;;  %v5422_v42 = vld [vmem:[%s6064_s26 + $0x724] ss:$12 sps:$4 sm:$0xff]  }
 0x271   : > { %3076 = vmatprep.subr.bf16.mxu1 %v5367_v43  ;;  %4949 = vmatprep.subr.bf16.mxu0 %v5368_v46  ;;  %v6498_v43 = vsel %vm3408_vm6, %v6492_v40, %v6396_v12  ;;  %v5420_v46 = vld [vmem:[%s6064_s26 + $0x720] ss:$12 sps:$4 sm:$0xff]   ;;  %v5423_v12 = vld [vmem:[%s6064_s26 + $0x678] ss:$12 sps:$4 sm:$0xff]  }
 0x274   : > { %3077 = vmatpush1.bf16.msra.mxu1 %v5365_v47  ;;  %4950 = vmatpush3.bf16.msra.mxu0 %v5369_v48  ;;  %v5425_v47 = vld [vmem:[%s6064_s26 + $0x67c] ss:$12 sps:$4 sm:$0xff]  }
 0x275   : > { %3078 = vmatprep.subr.bf16.mxu1 %v5372_v50  ;;  %4951 = vmatprep.subr.bf16.mxu0 %v5373_v52  ;;  %v5428_v48 = vld [vmem:[%s6064_s26 + $0x73c] ss:$12 sps:$4 sm:$0xff]   ;;  %v5426_v52 = vld [vmem:[%s6064_s26 + $0x738] ss:$12 sps:$4 sm:$0xff]  }
 0x276   : > { %v6508_v50 = vld [vmem:[%s6072_s21] sm:$0x15] }
 0x277   : > { %v6515_v57 = vunpack.c.l.bf16 %v6508_v50 }
 0x278   : > { %3079 = vmatpush1.bf16.msra.mxu1 %v5370_v54  ;;  %4952 = vmatpush3.bf16.msra.mxu0 %v5374_v55  ;;  %v5431_v54 = vld [vmem:[%s6064_s26 + $0x694] ss:$12 sps:$4 sm:$0xff]  }
 0x279   : > { %3080 = vmatprep.subr.bf16.mxu1 %v5377_v56  ;;  %3186 = vmatprep.subr.bf16.mxu0 %v5773_v0  ;;  %v5434_v55 = vld [vmem:[%s6064_s26 + $0x754] ss:$12 sps:$4 sm:$0xff]  }
 0x27a   : > { %v1138_v56 = vld [vmem:[%s6070_s15] ss:$4 sm:$0x7] }
 0x27b   : > { %3179 = vmatmul.mubr.bf16.vlgmr.msra.gmra.mrb[28].mxu0 %v6446_v61 }
 0x27c   : > { %3081 = vmatpush1.bf16.msra.mxu1 %v5375_v58  ;;  %3187 = vmatpush1.bf16.msra.mxu0 %v5378_v59  ;;  %v5429_v58 = vld [vmem:[%s6064_s26 + $0x690] ss:$12 sps:$4 sm:$0xff]   ;;  %v1726_v59 = vunpack.c.h.bf16 %v6508_v50 }
 0x27d   : > { %4707 = vmatprep.mubr.msk.bf16.mxu0 %vm1555_vm3, %v6360_v11  ;;  %3082 = vmatprep.subr.bf16.mxu1 %v5381_v60  ;;  %v5432_v60 = vld [vmem:[%s6064_s26 + $0x750] ss:$12 sps:$4 sm:$0xff]  }
 0x27e   : > { %3188 = vmatprep.subr.bf16.mxu0 %v5773_v0 }
 0x280   : > { %3083 = vmatpush1.bf16.msra.mxu1 %v5379_v62  ;;  %3189 = vmatpush1.bf16.msra.mxu0 %v5382_v63  ;;  %v1151_v62 = vrot.slane %v1138_v56, %v6239_v24  ;;  %v5440_v63 = vld [vmem:[%s6064_s26 + $0x76c] ss:$12 sps:$4 sm:$0xff]  }
 0x281   : > { %3084 = vmatprep.subr.bf16.mxu1 %v5385_v1  ;;  %3190 = vmatprep.subr.bf16.mxu0 %v5773_v0  ;;  %v1143_v1 = vrot.slane %v1138_v56, %v6187_v31 }
 0x284   : > { %3085 = vmatpush1.bf16.msra.mxu1 %v5383_v2  ;;  %3191 = vmatpush1.bf16.msra.mxu0 %v5386_v3  ;;  %v1732_v2 = vrot.slane %v6515_v57, %v6187_v31  ;;  %v1740_v3 = vrot.slane %v1726_v59, %v6187_v31 }
 0x285   : > { %3086 = vmatprep.subr.bf16.mxu1 %v5389_v4  ;;  %3192 = vmatprep.subr.bf16.mxu0 %v5773_v0  ;;  %v5435_v4 = vld [vmem:[%s6064_s26 + $0x6a8] ss:$12 sps:$4 sm:$0xff]  }
 0x288   : > { %3087 = vmatpush1.bf16.msra.mxu1 %v5387_v5  ;;  %3193 = vmatpush1.bf16.msra.mxu0 %v5390_v6  ;;  %v5438_v5 = vld [vmem:[%s6064_s26 + $0x768] ss:$12 sps:$4 sm:$0xff]   ;;  %v1147_v6 = vrot.slane %v1138_v56, %v6193_v33  ;;  %v5456_v56 = vld [vmem:[%s6064_s26 + $0x7b0] ss:$12 sps:$4 sm:$0xff]  }
 0x289   : > { %3088 = vmatprep.subr.bf16.mxu1 %v5393_v7  ;;  %3194 = vmatprep.subr.bf16.mxu0 %v5773_v0  ;;  %v1736_v7 = vrot.slane %v6515_v57, %v6205_v41  ;;  %v5441_v41 = vld [vmem:[%s6064_s26 + $0x6c0] ss:$12 sps:$4 sm:$0xff]  }
 0x28b   : > { %v4909_v32 = vpop.f32.mrb[16].mxu0 }
 0x28c   : > { %3089 = vmatpush1.bf16.msra.mxu1 %v5391_v8  ;;  %3195 = vmatpush1.bf16.msra.mxu0 %v5394_v9  ;;  %v4910_v13 = vpop.f32.mrb[17].mxu0  ;;  %v5443_v8 = vld [vmem:[%s6064_s26 + $0x6c4] ss:$12 sps:$4 sm:$0xff]  }
 0x28d   : > { %v6469_v15 = vadd.f32 %v4910_v13, %v4909_v32  ;;  %v4912_v16 = vpop.f32.mrb[18].mxu0  ;;  %3090 = vmatprep.subr.bf16.mxu1 %v5397_v10  ;;  %3196 = vmatprep.subr.bf16.mxu0 %v5773_v0  ;;  %v5446_v10 = vld [vmem:[%s6064_s26 + $0x784] ss:$12 sps:$4 sm:$0xff]  }
 0x28e   : > { %v4913_v18 = vpop.f32.mrb[19].mxu0 }
 0x28f   : > { %v1676_v9 = vadd.f32 %v6469_v15, %v1151_v62  ;;  %v1751_v15 = vrot.slane %v1736_v7, %v6187_v31  ;;  %v5463_v62 = vld [vmem:[%s6064_s26 + $0x710] ss:$12 sps:$4 sm:$0xff]   ;;  %v5473_v7 = vld [vmem:[%s6064_s26 + $0x740] ss:$12 sps:$4 sm:$0xff]  }
 0x290   : > { %3091 = vmatpush1.bf16.msra.mxu1 %v5395_v14  ;;  %3197 = vmatpush1.bf16.msra.mxu0 %v5398_v44  ;;  %v1747_v44 = vrot.slane %v1732_v2, %v6187_v31  ;;  %v5466_v2 = vld [vmem:[%s6064_s26 + $0x7e4] ss:$12 sps:$4 sm:$0xff]  }
 0x291   : > { %3092 = vmatprep.subr.bf16.mxu1 %v5401_v17  ;;  %3198 = vmatprep.subr.bf16.mxu0 %v5773_v0  ;;  %v1755_v17 = vrot.slane %v1740_v3, %v6187_v31  ;;  %v5468_v3 = vld [vmem:[%s6064_s26 + $0x728] ss:$12 sps:$4 sm:$0xff]  }
 0x294   : > { %3093 = vmatpush1.bf16.msra.mxu1 %v5399_v19  ;;  %3199 = vmatpush1.bf16.msra.mxu0 %v5402_v22 }
 0x295   : > { %3094 = vmatprep.subr.bf16.mxu1 %v5405_v23  ;;  %3200 = vmatprep.subr.bf16.mxu0 %v5773_v0 }
 0x298   : > { %3095 = vmatpush1.bf16.msra.mxu1 %v5403_v25  ;;  %3201 = vmatpush1.bf16.msra.mxu0 %v5406_v26  ;;  %v5444_v26 = vld [vmem:[%s6064_s26 + $0x780] ss:$12 sps:$4 sm:$0xff]  }
 0x299   : > { %3105 = vmatprep.subr.bf16.mxu1 %v5409_v27  ;;  %3202 = vmatprep.subr.bf16.mxu0 %v5773_v0  ;;  %v5449_v27 = vld [vmem:[%s6064_s26 + $0x6dc] ss:$12 sps:$4 sm:$0xff]  }
 0x29b   : > { %3097 = vmatmul.mubr.bf16.vlgmr.msra.gmra.mrb[24].mxu1 %v6446_v61  ;;  %v5437_v61 = vld [vmem:[%s6064_s26 + $0x6ac] ss:$12 sps:$4 sm:$0xff]  }
 0x29c   : > { %3106 = vmatpush1.bf16.msra.mxu1 %v5407_v28  ;;  %4706 = vmatprep.mubr.msk.bf16.mxu1 %vm1555_vm3, %v6360_v11  ;;  %v5417_v11 = vld [vmem:[%s6064_s26 + $0x660] ss:$12 sps:$4 sm:$0xff]  }
 0x29d   : > { %3203 = vmatpush1.bf16.msra.mxu0 %v5410_v29  ;;  %3107 = vmatprep.subr.bf16.mxu1 %v5413_v35 }
 0x29e   : > { %3818 = vmatprep.subr.bf16.mxu0 %v5416_v36 }
 0x2a0   : > { %3219 = vmatmul.mubr.bf16.vlgmr.msra.gmra.mrb[32].mxu0 %v6365_v51  ;;  %3108 = vmatpush1.bf16.msra.mxu1 %v5411_v37  ;;  %v5452_v37 = vld [vmem:[%s6064_s26 + $0x79c] ss:$12 sps:$4 sm:$0xff]  }
 0x2a1   : > { %3819 = vmatpush1.bf16.msra.mxu0 %v5414_v38  ;;  %3109 = vmatprep.subr.bf16.mxu1 %v5419_v39 }
 0x2a2   : > { %3820 = vmatprep.subr.bf16.mxu0 %v5422_v42  ;;  %3850 = vmatprep.mubr.bf16.mxu0 %v6498_v43 }
 0x2a4   : > { %3110 = vmatpush1.bf16.msra.mxu1 %v5417_v11  ;;  %v5447_v11 = vld [vmem:[%s6064_s26 + $0x6d8] ss:$12 sps:$4 sm:$0xff]  }
 0x2a5   : > { %3821 = vmatpush1.bf16.msra.mxu0 %v5420_v46  ;;  %3111 = vmatprep.subr.bf16.mxu1 %v5425_v47  ;;  %v5450_v47 = vld [vmem:[%s6064_s26 + $0x798] ss:$12 sps:$4 sm:$0xff]  }
 0x2a6   : > { %3822 = vmatprep.subr.bf16.mxu0 %v5428_v48  ;;  %v5455_v48 = vld [vmem:[%s6064_s26 + $0x6f4] ss:$12 sps:$4 sm:$0xff]  }
 0x2a8   : > { %3112 = vmatpush1.bf16.msra.mxu1 %v5423_v12  ;;  %v5458_v12 = vld [vmem:[%s6064_s26 + $0x7b4] ss:$12 sps:$4 sm:$0xff]  }
 0x2a9   : > { %3823 = vmatpush1.bf16.msra.mxu0 %v5426_v52  ;;  %3113 = vmatprep.subr.bf16.mxu1 %v5431_v54  ;;  %v5453_v54 = vld [vmem:[%s6064_s26 + $0x6f0] ss:$12 sps:$4 sm:$0xff]  }
 0x2aa   : > { %3824 = vmatprep.subr.bf16.mxu0 %v5434_v55 }
 0x2ac   : > { %3114 = vmatpush1.bf16.msra.mxu1 %v5429_v58  ;;  %v5462_v58 = vld [vmem:[%s6064_s26 + $0x7d0] ss:$12 sps:$4 sm:$0xff]  }
 0x2ad   : > { %3825 = vmatpush1.bf16.msra.mxu0 %v5432_v60  ;;  %3115 = vmatprep.subr.bf16.mxu1 %v5437_v61  ;;  %v5461_v61 = vld [vmem:[%s6064_s26 + $0x7cc] ss:$12 sps:$4 sm:$0xff]  }
 0x2ae   : > { %3826 = vmatprep.subr.bf16.mxu0 %v5440_v63  ;;  %v5459_v63 = vld [vmem:[%s6064_s26 + $0x7c8] ss:$12 sps:$4 sm:$0xff]  }
 0x2af   : > { %v1634_v32 = vpop.f32.mrb[12].mxu1  ;;  %v1715_v13 = vpop.f32.mrb[20].mxu0 }
 0x2b0   : > { %v4989_v14 = vadd.f32 %v1634_v32, %v1143_v1  ;;  %v1716_v16 = vadd.f32 %v1715_v13, %v1676_v9  ;;  %v1636_v18 = vpop.f32.mrb[13].mxu1  ;;  %v1717_v19 = vpop.f32.mrb[21].mxu0  ;;  %3116 = vmatpush1.bf16.msra.mxu1 %v5435_v4  ;;  %v5467_v1 = vld [vmem:[%s6064_s26 + $0x7e8] ss:$12 sps:$4 sm:$0xff]   ;;  %v5464_v4 = vld [vmem:[%s6064_s26 + $0x7e0] ss:$12 sps:$4 sm:$0xff]  }
 0x2b1   : > { %v4990_v22 = vadd.f32 %v1636_v18, %v1147_v6  ;;  %3827 = vmatpush1.bf16.msra.mxu0 %v5438_v5  ;;  %v1638_v23 = vpop.f32.mrb[14].mxu1  ;;  %v1718_v25 = vpop.f32.mrb[22].mxu0  ;;  %3117 = vmatprep.subr.bf16.mxu1 %v5443_v8  ;;  %v5472_v5 = vld [vmem:[%s6064_s26 + $0x800] ss:$12 sps:$4 sm:$0xff]   ;;  %v5471_v6 = vld [vmem:[%s6064_s26 + $0x7fc] ss:$12 sps:$4 sm:$0xff]  }
 0x2b2   : > { %v1721_v28 = vmax.f32 %v4989_v14, 0.0  ;;  %v1723_v29 = vmax.f32 %v1716_v16, 0.0  ;;  %v1639_v35 = vpop.f32.mrb[15].mxu1  ;;  %v1719_v36 = vpop.f32.mrb[23].mxu0  ;;  %3828 = vmatprep.subr.bf16.mxu0 %v5446_v10  ;;  %v5477_v8 = vld [vmem:[%s6064_s26 + $0x818] ss:$12 sps:$4 sm:$0xff]  }
 0x2b3   : > { %v1722_v38 = vmax.f32 %v4990_v22, 0.0  ;;  %v5478_v9 = vld [vmem:[%s6064_s26 + $0x758] ss:$12 sps:$4 sm:$0xff]   ;;  %v5474_v10 = vld [vmem:[%s6064_s26 + $0x810] ss:$12 sps:$4 sm:$0xff]   ;;  %v3401_v35 = vpop.permute.xlu0 %3400 }
 0x2b4   : > { %v1756_v39 = vmul.f32 %v1747_v44, %v1721_v28  ;;  %v1758_v42 = vmul.f32 %v1755_v17, %v1723_v29  ;;  %3118 = vmatpush1.bf16.msra.mxu1 %v5441_v41  ;;  %v5482_v32 = vld [vmem:[%s6064_s26 + $0x830] ss:$12 sps:$4 sm:$0xff]   ;;  %v5481_v13 = vld [vmem:[%s6064_s26 + $0x82c] ss:$12 sps:$4 sm:$0xff]   ;;  %v5479_v44 = vld [vmem:[%s6064_s26 + $0x828] ss:$12 sps:$4 sm:$0xff]  }
 0x2b5   : > { %v1757_v46 = vmul.f32 %v1751_v15, %v1722_v38  ;;  %3829 = vmatpush1.bf16.msra.mxu0 %v5444_v26  ;;  %3119 = vmatprep.subr.bf16.mxu1 %v5449_v27  ;;  %v5483_v14 = vld [vmem:[%s6064_s26 + $0x770] ss:$12 sps:$4 sm:$0xff]   ;;  %v5487_v16 = vld [vmem:[%s6064_s26 + $0x848] ss:$12 sps:$4 sm:$0xff]   ;;  %v5484_v19 = vld [vmem:[%s6064_s26 + $0x840] ss:$12 sps:$4 sm:$0xff]   ;;  %v3409_v38 = vsel %vm3408_vm6, %v3401_v35, %v6492_v40 }
 0x2b6   : > { %3830 = vmatprep.subr.bf16.mxu0 %v5452_v37  ;;  %v1761_v55 = vsel %vm1760_vm7, %v1758_v42, 0.0  ;;  %v5486_v17 = vld [vmem:[%s6064_s26 + $0x844] ss:$12 sps:$4 sm:$0xff]   ;;  %v5488_v18 = vld [vmem:[%s6064_s26 + $0x788] ss:$12 sps:$4 sm:$0xff]  }
 0x2b7   : > { %v1759_v52 = vadd.f32 %v1757_v46, %v1756_v39  ;;  %v5492_v41 = vld [vmem:[%s6064_s26 + $0x860] ss:$12 sps:$4 sm:$0xff]   ;;  %v5491_v22 = vld [vmem:[%s6064_s26 + $0x85c] ss:$12 sps:$4 sm:$0xff]   ;;  %v5489_v23 = vld [vmem:[%s6064_s26 + $0x858] ss:$12 sps:$4 sm:$0xff]  }
 0x2b8   : > { %3120 = vmatpush1.bf16.msra.mxu1 %v5447_v11  ;;  %v5493_v15 = vld [vmem:[%s6064_s26 + $0x7a0] ss:$12 sps:$4 sm:$0xff]   ;;  %v5497_v25 = vld [vmem:[%s6064_s26 + $0x878] ss:$12 sps:$4 sm:$0xff]   ;;  %v5494_v28 = vld [vmem:[%s6064_s26 + $0x870] ss:$12 sps:$4 sm:$0xff]  }
 0x2b9   : > { %3831 = vmatpush1.bf16.msra.mxu0 %v5450_v47  ;;  %3121 = vmatprep.subr.bf16.mxu1 %v5455_v48  ;;  %v6552_v60 = vadd.f32 %v1761_v55, %v1759_v52  ;;  %v5496_v26 = vld [vmem:[%s6064_s26 + $0x874] ss:$12 sps:$4 sm:$0xff]   ;;  %v5498_v27 = vld [vmem:[%s6064_s26 + $0x7b8] ss:$12 sps:$4 sm:$0xff]   ;;  %v5502_v36 = vld [vmem:[%s6064_s26 + $0x890] ss:$12 sps:$4 sm:$0xff]  }
 0x2ba   : > { %3832 = vmatprep.subr.bf16.mxu0 %v5458_v12  ;;  %v5501_v29 = vld [vmem:[%s6064_s26 + $0x88c] ss:$12 sps:$4 sm:$0xff]   ;;  %v5499_v37 = vld [vmem:[%s6064_s26 + $0x888] ss:$12 sps:$4 sm:$0xff]   ;;  %v5505_v39 = vld [vmem:[%s6064_s26 + $0x8a4] ss:$12 sps:$4 sm:$0xff]  }
 0x2bb   : > { %v5506_v42 = vld [vmem:[%s6064_s26 + $0x8a8] ss:$12 sps:$4 sm:$0xff]   ;;  %v5503_v11 = vld [vmem:[%s6064_s26 + $0x8a0] ss:$12 sps:$4 sm:$0xff]   ;;  %v5507_v47 = vld [vmem:[%s6064_s26 + $0x8b8] ss:$12 sps:$4 sm:$0xff]  }
 0x2bc   : > { %3122 = vmatpush1.bf16.msra.mxu1 %v5453_v54  ;;  %v5509_v46 = vld [vmem:[%s6064_s26 + $0x8bc] ss:$12 sps:$4 sm:$0xff]   ;;  %v5510_v40 = vld [vmem:[%s6064_s26 + $0x8c0] ss:$12 sps:$4 sm:$0xff]   ;;  %v5514_v12 = vld [vmem:[%s6064_s26 + $0x8d8] ss:$12 sps:$4 sm:$0xff]  }
 0x2bd   : > { %3833 = vmatpush1.bf16.msra.mxu0 %v5456_v56  ;;  %4959 = vmatprep.subr.bf16.mxu1 %v5462_v58  ;;  %v5513_v48 = vld [vmem:[%s6064_s26 + $0x8d4] ss:$12 sps:$4 sm:$0xff]   ;;  %v5511_v52 = vld [vmem:[%s6064_s26 + $0x8d0] ss:$12 sps:$4 sm:$0xff]  }
 0x2be   : > { %3834 = vmatprep.subr.bf16.mxu0 %v5461_v61  ;;  %v5518_v54 = vld [vmem:[%s6064_s26 + $0x8f0] ss:$12 sps:$4 sm:$0xff]   ;;  %v5515_v55 = vld [vmem:[%s6064_s26 + $0x8e8] ss:$12 sps:$4 sm:$0xff]   ;;  %v5519_v61 = vld [vmem:[%s6064_s26 + $0x900] ss:$12 sps:$4 sm:$0xff]  }
 0x2bf   : > { %3138 = vmatmul.mubr.bf16.vlgmr.msra.gmra.mrb[24].mxu1 %v6365_v51  ;;  %v5469_v51 = vld [vmem:[%s6064_s26 + $0x7f8] ss:$12 sps:$4 sm:$0xff]   ;;  %v5522_v58 = vld [vmem:[%s6064_s26 + $0x908] ss:$12 sps:$4 sm:$0xff]  }
 0x2c0   : > { %4960 = vmatpush3.bf16.msra.mxu1 %v5463_v62  ;;  %3932 = vmatprep.mubr.bf16.mxu1 %v6498_v43  ;;  %v5476_v43 = vld [vmem:[%s6064_s26 + $0x814] ss:$12 sps:$4 sm:$0xff]   ;;  %v5521_v56 = vld [vmem:[%s6064_s26 + $0x904] ss:$12 sps:$4 sm:$0xff]   ;;  %v5525_v62 = vld [vmem:[%s6064_s26 + $0x91c] ss:$12 sps:$4 sm:$0xff]  }
 0x2c1   : > { %3835 = vmatpush1.bf16.msra.mxu0 %v5459_v63  ;;  %4961 = vmatprep.subr.bf16.mxu1 %v5467_v1  ;;  %v5526_v63 = vld [vmem:[%s6064_s26 + $0x920] ss:$12 sps:$4 sm:$0xff]   ;;  %v5523_v1 = vld [vmem:[%s6064_s26 + $0x918] ss:$12 sps:$4 sm:$0xff]  }
 0x2c2   : > { %3836 = vmatprep.subr.bf16.mxu0 %v5466_v2  ;;  %v5529_v2 = vld [vmem:[%s6064_s26 + $0x934] ss:$12 sps:$4 sm:$0xff]  }
 0x2c4   : > { %4962 = vmatpush3.bf16.msra.mxu1 %v5468_v3  ;;  %v5530_v3 = vld [vmem:[%s6064_s26 + $0x938] ss:$12 sps:$4 sm:$0xff]  }
 0x2c5   : > { %3837 = vmatpush1.bf16.msra.mxu0 %v5464_v4  ;;  %4963 = vmatprep.subr.bf16.mxu1 %v5472_v5  ;;  %v5527_v4 = vld [vmem:[%s6064_s26 + $0x930] ss:$12 sps:$4 sm:$0xff]   ;;  %v5533_v5 = vld [vmem:[%s6064_s26 + $0x94c] ss:$12 sps:$4 sm:$0xff]  }
 0x2c6   : > { %3838 = vmatprep.subr.bf16.mxu0 %v5471_v6  ;;  %v5534_v6 = vld [vmem:[%s6064_s26 + $0x950] ss:$12 sps:$4 sm:$0xff]  }
 0x2c8   : > { %4964 = vmatpush3.bf16.msra.mxu1 %v5473_v7  ;;  %v5531_v7 = vld [vmem:[%s6064_s26 + $0x948] ss:$12 sps:$4 sm:$0xff]  }
 0x2c9   : > { %3839 = vmatpush1.bf16.msra.mxu0 %v5469_v51  ;;  %4965 = vmatprep.subr.bf16.mxu1 %v5477_v8 }
 0x2ca   : > { %3840 = vmatprep.subr.bf16.mxu0 %v5476_v43 }
 0x2cc   : > { %4966 = vmatpush3.bf16.msra.mxu1 %v5478_v9 }
 0x2cd   : > { %3841 = vmatpush1.bf16.msra.mxu0 %v5474_v10  ;;  %4967 = vmatprep.subr.bf16.mxu1 %v5482_v32  ;;  %v4451_v32 = vld [vmem:[%s6070_s15 + $0x1] ss:$4 sm:$0x7] }
 0x2ce   : > { %3842 = vmatprep.subr.bf16.mxu0 %v5481_v13  ;;  %v1889_v13 = vrot.slane %v4451_v32, %v6239_v24 }
 0x2d0   : > { %4968 = vmatpush3.bf16.msra.mxu1 %v5483_v14  ;;  %v1881_v14 = vrot.slane %v4451_v32, %v6187_v31 }
 0x2d1   : > { %3843 = vmatpush1.bf16.msra.mxu0 %v5479_v44  ;;  %4969 = vmatprep.subr.bf16.mxu1 %v5487_v16  ;;  %v2491_v44 = vrot.slane %v1726_v59, %v6193_v33  ;;  %v1885_v16 = vrot.slane %v4451_v32, %v6193_v33 }
 0x2d2   : > { %3844 = vmatprep.subr.bf16.mxu0 %v5486_v17 }
 0x2d4   : > { %4970 = vmatpush3.bf16.msra.mxu1 %v5488_v18 }
 0x2d5   : > { %3845 = vmatpush1.bf16.msra.mxu0 %v5484_v19  ;;  %4971 = vmatprep.subr.bf16.mxu1 %v5492_v41 }
 0x2d6   : > { %3846 = vmatprep.subr.bf16.mxu0 %v5491_v22 }
 0x2d8   : > { %4972 = vmatpush3.bf16.msra.mxu1 %v5493_v15 }
 0x2d9   : > { %3847 = vmatpush1.bf16.msra.mxu0 %v5489_v23  ;;  %4973 = vmatprep.subr.bf16.mxu1 %v5497_v25  ;;  %v2506_v23 = vrot.slane %v2491_v44, %v6193_v33 }
 0x2da   : > { %3848 = vmatprep.subr.bf16.mxu0 %v5496_v26 }
 0x2dc   : > { %4974 = vmatpush3.bf16.msra.mxu1 %v5498_v27 }
 0x2dd   : > { %3849 = vmatpush1.bf16.msra.mxu0 %v5494_v28  ;;  %3940 = vmatprep.subr.bf16.mxu1 %v5773_v0 }
 0x2de   : > { %3859 = vmatprep.subr.bf16.mxu0 %v5501_v29 }
 0x2df   : > { %3933 = vmatmul.mubr.bf16.vlgmr.msra.gmra.mrb[28].mxu1 %v3409_v38 }
 0x2e0   : > { %3851 = vmatmul.mubr.bf16.vlgmr.msra.gmra.mrb[36].mxu0 %v3409_v38  ;;  %3941 = vmatpush1.bf16.msra.mxu1 %v5502_v36 }
 0x2e1   : > { %3860 = vmatpush1.bf16.msra.mxu0 %v5499_v37  ;;  %3942 = vmatprep.subr.bf16.mxu1 %v5773_v0 }
 0x2e2   : > { %3861 = vmatprep.subr.bf16.mxu0 %v5505_v39  ;;  %4885 = vmatprep.mubr.msk.bf16.mxu0 %vm1555_vm3, %v6410_v20 }
 0x2e3   : > { %4886 = vmatprep.mubr.msk.bf16.mxu1 %vm1555_vm3, %v6410_v20  ;;  %v5517_v20 = vld [vmem:[%s6064_s26 + $0x8ec] ss:$12 sps:$4 sm:$0xff]  }
 0x2e4   : > { %3943 = vmatpush1.bf16.msra.mxu1 %v5506_v42 }
 0x2e5   : > { %3862 = vmatpush1.bf16.msra.mxu0 %v5503_v11  ;;  %3944 = vmatprep.subr.bf16.mxu1 %v5773_v0 }
 0x2e6   : > { %3863 = vmatprep.subr.bf16.mxu0 %v5509_v46 }
 0x2e8   : > { %3945 = vmatpush1.bf16.msra.mxu1 %v5510_v40 }
 0x2e9   : > { %3864 = vmatpush1.bf16.msra.mxu0 %v5507_v47  ;;  %3946 = vmatprep.subr.bf16.mxu1 %v5773_v0 }
 0x2ea   : > { %3865 = vmatprep.subr.bf16.mxu0 %v5513_v48 }
 0x2ec   : > { %3947 = vmatpush1.bf16.msra.mxu1 %v5514_v12 }
 0x2ed   : > { %3866 = vmatpush1.bf16.msra.mxu0 %v5511_v52  ;;  %3948 = vmatprep.subr.bf16.mxu1 %v5773_v0 }
 0x2ee   : > { %3867 = vmatprep.subr.bf16.mxu0 %v5517_v20  ;;  %v4630_v20 = vld [vmem:[%s6070_s15 + $0x2] ss:$4 sm:$0x7] }
 0x2f0   : > { %3949 = vmatpush1.bf16.msra.mxu1 %v5518_v54  ;;  %v2639_v54 = vrot.slane %v4630_v20, %v6239_v24 }
 0x2f1   : > { %3868 = vmatpush1.bf16.msra.mxu0 %v5515_v55  ;;  %3950 = vmatprep.subr.bf16.mxu1 %v5773_v0 }
 0x2f2   : > { %3869 = vmatprep.subr.bf16.mxu0 %v5521_v56 }
 0x2f4   : > { %3951 = vmatpush1.bf16.msra.mxu1 %v5522_v58 }
 0x2f5   : > { %3870 = vmatpush1.bf16.msra.mxu0 %v5519_v61  ;;  %3952 = vmatprep.subr.bf16.mxu1 %v5773_v0 }
 0x2f6   : > { %3871 = vmatprep.subr.bf16.mxu0 %v5525_v62 }
 0x2f8   : > { %3953 = vmatpush1.bf16.msra.mxu1 %v5526_v63 }
 0x2f9   : > { %3872 = vmatpush1.bf16.msra.mxu0 %v5523_v1  ;;  %3954 = vmatprep.subr.bf16.mxu1 %v5773_v0  ;;  %v3229_v1 = vld [vmem:[%s6072_s21] sm:$0x2a] }
 0x2fa   : > { %3873 = vmatprep.subr.bf16.mxu0 %v5529_v2  ;;  %v3230_v2 = vunpack.c.l.bf16 %v3229_v1 }
 0x2fc   : > { %3955 = vmatpush1.bf16.msra.mxu1 %v5530_v3  ;;  %v3231_v3 = vunpack.c.h.bf16 %v3229_v1  ;;  %v4887_v1 = vld [vmem:[%s494_s13 + $0x3] ss:$0 sm:$0xff] }
 0x2fd   : > { %3874 = vmatpush1.bf16.msra.mxu0 %v5527_v4  ;;  %3956 = vmatprep.subr.bf16.mxu1 %v5773_v0  ;;  %v2483_v0 = vrot.slane %v6515_v57, %v6193_v33 }
 0x2fe   : > { %3875 = vmatprep.subr.bf16.mxu0 %v5533_v5  ;;  %v3245_v4 = vrot.slane %v3231_v3, %v6239_v24  ;;  %v3237_v5 = vrot.slane %v3230_v2, %v6239_v24 }
 0x2ff   : > { %v2498_v22 = vrot.slane %v2483_v0, %v6193_v33 }
 0x300   : > { %3957 = vmatpush1.bf16.msra.mxu1 %v5534_v6  ;;  %v3241_v6 = vrot.slane %v3230_v2, %v553_v49 }
 0x301   : > { %3876 = vmatpush1.bf16.msra.mxu0 %v5531_v7  ;;  %v2635_v7 = vrot.slane %v4630_v20, %v6193_v33 }
 0x303   : > { %3973 = vmatmul.mubr.bf16.vlgmr.msra.gmra.mrb[32].mxu1 %v6415_v21 }
 0x304   : > { %3892 = vmatmul.mubr.bf16.vlgmr.msra.gmra.mrb[36].mxu0 %v6415_v21  ;;  %v2487_v21 = vrot.slane %v6515_v57, %v549_v45 }
 0x306   : > { %v2502_v50 = vrot.slane %v2487_v21, %v6193_v33 }
 0x30a   : > { %v4931_v51 = vpop.f32.mrb[16].mxu1 }
 0x30b   : > { %v4932_v8 = vpop.f32.mrb[17].mxu1 }
 0x30c   : > { %v4933_v43 = vadd.f32 %v4932_v8, %v4931_v51  ;;  %v4934_v9 = vpop.f32.mrb[18].mxu1 }
 0x30d   : > { %v4935_v10 = vpop.f32.mrb[19].mxu1 }
 0x30e   : > { %v2432_v17 = vadd.f32 %v4933_v43, %v1889_v13  ;;  %v3260_v43 = vrot.slane %v3245_v4, %v6239_v24  ;;  %v3252_v10 = vrot.slane %v3237_v5, %v6239_v24 }
 0x32e   : > { %v2390_v18 = vpop.f32.mrb[24].mxu0  ;;  %v2471_v19 = vpop.f32.mrb[20].mxu1 }
 0x32f   : > { %v4991_v41 = vadd.f32 %v2390_v18, %v1881_v14  ;;  %v2472_v15 = vadd.f32 %v2471_v19, %v2432_v17  ;;  %v2392_v25 = vpop.f32.mrb[25].mxu0  ;;  %v2473_v26 = vpop.f32.mrb[21].mxu1  ;;  %v3256_v14 = vrot.slane %v3241_v6, %v6239_v24  ;;  %v4708_v6 = vld [vmem:[%s494_s13 + $0x2] ss:$0 sm:$0xff] }
 0x330   : > { %v4992_v27 = vadd.f32 %v2392_v25, %v1885_v16  ;;  %v2394_v59 = vpop.f32.mrb[26].mxu0  ;;  %v2474_v28 = vpop.f32.mrb[22].mxu1 }
 0x331   : > { %v2477_v29 = vmax.f32 %v4991_v41, 0.0  ;;  %v2479_v45 = vmax.f32 %v2472_v15, 0.0  ;;  %v2395_v57 = vpop.f32.mrb[27].mxu0  ;;  %v2475_v35 = vpop.f32.mrb[23].mxu1 }
 0x332   : > { %v2478_v36 = vmax.f32 %v4992_v27, 0.0  ;;  %v3990_v57 = vrot.slane %v3230_v2, %v557_v53 }
 0x333   : > { %v2507_v37 = vmul.f32 %v2498_v22, %v2477_v29  ;;  %v2509_v38 = vmul.f32 %v2506_v23, %v2479_v45  ;;  %v3986_v29 = vrot.slane %v3230_v2, %v6196_v34  ;;  %v3994_v45 = vrot.slane %v3231_v3, %v6196_v34 }
 0x334   : > { %v2508_v39 = vmul.f32 %v2502_v50, %v2478_v36  ;;  %v4809_v50 = vld [vmem:[%s6070_s15 + $0x3] ss:$4 sm:$0x7]  ;;  %v4005_v30 = vrot.slane %v3990_v57, %v6196_v34 }
 0x335   : > { %v2511_v11 = vsel %vm1760_vm7, %v2509_v38, 0.0  ;;  %v3393_v59 = vrot.slane %v4809_v50, %v6239_v24  ;;  %v3385_v28 = vrot.slane %v4809_v50, %v6187_v31  ;;  %v3389_v36 = vrot.slane %v4809_v50, %v6193_v33 }
 0x336   : > { %v2510_v42 = vadd.f32 %v2508_v39, %v2507_v37  ;;  %v4009_v24 = vrot.slane %v3994_v45, %v6196_v34 }
 0x338   : > { %v2512_v46 = vadd.f32 %v2511_v11, %v2510_v42 }
 0x33a   : > { %2513 = vadd.xlane.f32.xlu0 %v2512_v46  ;;  %v4001_v46 = vrot.slane %v3986_v29, %v6196_v34  ;;  %v4529_v34 = vld [vmem:[%s494_s13 + $0x1] ss:$0 sm:$0xff] }
 0x33e   : > { %1763 = vadd.xlane.f32.xlu0 %v6552_v60  ;;  %v2631_v60 = vrot.slane %v4630_v20, %v6187_v31 }
 0x34e   : > { %v4953_v40 = vpop.f32.mrb[28].mxu0 }
 0x34f   : > { %v4954_v47 = vpop.f32.mrb[29].mxu0 }
 0x350   : > { %v4955_v48 = vadd.f32 %v4954_v47, %v4953_v40  ;;  %v4956_v12 = vpop.f32.mrb[30].mxu0 }
 0x351   : > { %v4957_v52 = vpop.f32.mrb[31].mxu0 }
 0x352   : > { %v3181_v55 = vadd.f32 %v4955_v48, %v2639_v54 }
 0x373   : > { %v3220_v56 = vpop.f32.mrb[32].mxu0 }
 0x374   : > { %v3221_v58 = vadd.f32 %v3220_v56, %v3181_v55  ;;  %v3222_v61 = vpop.f32.mrb[33].mxu0 }
 0x375   : > { %v3223_v62 = vpop.f32.mrb[34].mxu0 }
 0x376   : > { %v3224_v63 = vpop.f32.mrb[35].mxu0  ;;  %v3228_v8 = vmax.f32 %v3221_v58, 0.0 }
 0x378   : > { %v3263_v17 = vmul.f32 %v3260_v43, %v3228_v8 }
 0x37a   : > { %v3265_v41 = vsel %vm1760_vm7, %v3263_v17, 0.0 }
 0x392   : > { %v3139_v51 = vpop.f32.mrb[24].mxu1 }
 0x393   : > { %v4993_v9 = vadd.f32 %v3139_v51, %v2631_v60  ;;  %v3141_v32 = vpop.f32.mrb[25].mxu1  ;;  %v4350_v51 = vld [vmem:[%s494_s13] ss:$0 sm:$0xff] }
 0x394   : > { %v4994_v13 = vadd.f32 %v3141_v32, %v2635_v7  ;;  %v3143_v0 = vpop.f32.mrb[26].mxu1 }
 0x395   : > { %v3226_v44 = vmax.f32 %v4993_v9, 0.0  ;;  %v3144_v21 = vpop.f32.mrb[27].mxu1 }
 0x396   : > { %v3227_v16 = vmax.f32 %v4994_v13, 0.0 }
 0x397   : > { %v3261_v49 = vmul.f32 %v3252_v10, %v3226_v44 }
 0x398   : > { %v3262_v18 = vmul.f32 %v3256_v14, %v3227_v16 }
 0x39a   : > { %v3264_v19 = vadd.f32 %v3262_v18, %v3261_v49 }
 0x39c   : > { %v3266_v22 = vadd.f32 %v3265_v41, %v3264_v19 }
 0x39e   : > { %3267 = vadd.xlane.f32.xlu0 %v3266_v22 }
 0x3b2   : > { %v4975_v15 = vpop.f32.mrb[28].mxu1 }
 0x3b3   : > { %v4976_v23 = vpop.f32.mrb[29].mxu1 }
 0x3b4   : > { %v4977_v25 = vadd.f32 %v4976_v23, %v4975_v15  ;;  %v4978_v26 = vpop.f32.mrb[30].mxu1 }
 0x3b5   : > { %v4979_v27 = vpop.f32.mrb[31].mxu1 }
 0x3b6   : > { %v3935_v35 = vadd.f32 %v4977_v25, %v3393_v59 }
 0x3c7   : > { %v2514_v63 = vpop.xlane.xlu0 %2513 }
 0x3c8   : > { %v2520_v3 = vadd.f32 %v4529_v34, %v2514_v63 }
 0x3cb   : > { %v1764_v5 = vpop.xlane.xlu0 %1763 }
 0x3cc   : > { %v1770_v43 = vadd.f32 %v4350_v51, %v1764_v5 }
 0x3d6   : > { %v3974_v37 = vpop.f32.mrb[32].mxu1 }
 0x3d7   : > { %v3893_v38 = vpop.f32.mrb[36].mxu0  ;;  %v3975_v39 = vadd.f32 %v3974_v37, %v3935_v35  ;;  %v3976_v42 = vpop.f32.mrb[33].mxu1 }
 0x3d8   : > { %v4995_v11 = vadd.f32 %v3893_v38, %v3385_v28  ;;  %v3895_v31 = vpop.f32.mrb[37].mxu0  ;;  %v3977_v40 = vpop.f32.mrb[34].mxu1 }
 0x3d9   : > { %v3982_v47 = vmax.f32 %v3975_v39, 0.0  ;;  %v4996_v48 = vadd.f32 %v3895_v31, %v3389_v36  ;;  %v3897_v53 = vpop.f32.mrb[38].mxu0  ;;  %v3978_v12 = vpop.f32.mrb[35].mxu1 }
 0x3da   : > { %v3980_v33 = vmax.f32 %v4995_v11, 0.0  ;;  %v3898_v52 = vpop.f32.mrb[39].mxu0 }
 0x3db   : > { %v3981_v20 = vmax.f32 %v4996_v48, 0.0  ;;  %v4012_v55 = vmul.f32 %v4009_v24, %v3982_v47 }
 0x3dc   : > { %v4010_v54 = vmul.f32 %v4001_v46, %v3980_v33 }
 0x3dd   : > { %v4011_v56 = vmul.f32 %v4005_v30, %v3981_v20  ;;  %v4014_v61 = vsel %vm1760_vm7, %v4012_v55, 0.0 }
 0x3df   : > { %v4013_v58 = vadd.f32 %v4011_v56, %v4010_v54 }
 0x3e1   : > { %v4015_v62 = vadd.f32 %v4014_v61, %v4013_v58 }
 0x3e3   : > { %4016 = vadd.xlane.f32.xlu1 %v4015_v62 }
 0x42b   : > { %v3268_v7 = vpop.xlane.xlu0 %3267 }
 0x42c   : > { %v3274_v8 = vadd.f32 %v4708_v6, %v3268_v7 }
 0x42e   : > { %v4024_v9 = vadd.f32 %v3274_v8, %v1770_v43 }
 0x470   : > { %v4017_v2 = vpop.xlane.xlu1 %4016 }
 0x471   : > { %v4023_v4 = vadd.f32 %v4887_v1, %v4017_v2 }
 0x473   : > { %v4025_v60 = vadd.f32 %v4023_v4, %v2520_v3 }
 0x475   : > { %4027 = vrot.lane.b32.xlu1 %v4025_v60, %s5779_s0 }
 0x4e7   : > { %v4028_v10 = vpop.permute.xlu1 %4027 }
 0x4e8   : > { %v4031_v32 = vsel %vm4030_vm8, %v4024_v9, %v4028_v10 }
 0x4e9   : > { %4033 = vst.msk [vmem:[%s498_s8] sm:$0xff] %vm4032_vm9, %v4031_v32 }
 0x4ea PF: > { %s6725_s9 = sld [smem:[#allocation16_spill]]  ;;  %s6726_s26 = sld [smem:[#allocation17_spill]] }
 0x4eb   : > { %p26_p13 = scmp.ge.s32.totalorder %s5842_s29, 7   ;;  %s6727_s24 = smov %s5753_s25 }
 0x4ec   : > { %s6729_s27 = smov %s5842_s29 }
 0x4ed   :  { %28 = sbr.rel (!%p26_p13) target bundleno = 13 (0xd), region = 158 }
 0x4f0   : > { %s6728_s25 = smov %s6725_s9 }
 0x4f4   :  { %4053 = vsyncpa [#allocation3], 1 }
 0x4f5   :  { %4055 = vsyncpa [#allocation3 + $0x1], 1 }
 0x4f6   :  { %4056 = vsyncpa [#allocation5], 1 }
 0x4f7   :  { %4058 = vsyncpa [#allocation5 + $0x1], 1 }
 0x4f8   :  { %4059 = vsyncpa [#allocation8], 1 }
 0x4f9   :  { %4061 = vsyncpa [#allocation8 + $0x1], 1 }
 0x4fa   :  { %4062 = vsyncpa [#allocation11], 1 }
 0x4fb   :  { %4064 = vsyncpa [#allocation11 + $0x1], 1 }

</bundles_post_ra>
